<compile_context>
chip_gen: v6e
topology: v6e:2x2x1
jax: 0.10.0
libtpu: 0.0.40
codegen_flags: <defaults>
</compile_context>

<pallas_src>
import jax
import jax.numpy as jnp
from jax.experimental import pallas as pl
from jax.experimental.pallas import tpu as pltpu

_BN_EPS = 1e-5


def _pos_embed_kernel(x_ref, w1f_ref, shift_ref, w2_ref, b2_ref, o_ref):
    # x_ref:     [C_in, TN]   channels-first input tile (lane-dense)
    # w1f_ref:   [F, C_in]    conv1 weight with BN scale folded in
    # shift_ref: [F, 1]       BN shift (beta - mean*scale); seeds the FMA chain (b1 cancelled)
    # w2_ref:    [F, F]       conv2 weight (f32 or bf16)
    # b2_ref:    [F, 1]       conv2 bias (f32)
    # o_ref:     [F, TN]      output tile, written lane-dense (no post-kernel transpose)
    x = x_ref[...]
    c_in = x.shape[0]
    # K = C_in = 3 conv as VPU broadcast-FMAs (outer products); no MXU padding from K=3 to 128/256.
    h = shift_ref[...] + w1f_ref[:, 0:1] * x[0:1, :]
    for c in range(1, c_in):                       # static, tiny (C_in == 3)
        h = h + w1f_ref[:, c:c + 1] * x[c:c + 1, :]
    h = jnp.maximum(h, 0.0)                        # ReLU (BN already folded into the FMA above)
    h = h.astype(w2_ref.dtype)                     # bf16 MXU operands when w2 is bf16
    acc = jnp.dot(w2_ref[...], h, preferred_element_type=jnp.float32) + b2_ref[...]
    o_ref[...] = acc.astype(o_ref.dtype)


def position_embedding_learned(xyz, params, *, mxu_bf16=True, out_dtype=jnp.float32):
    """xyz: (B, N, C_in) float32.  Returns (B, F, N) `out_dtype` (matches PyTorch NCW layout)."""
    B, N, C_in = xyz.shape
    w1, b1, gamma, beta, w2, b2 = params
    del b1  # exactly cancelled by training-mode BatchNorm mean subtraction
    F = w1.shape[0]

    xf = xyz.astype(jnp.float32)

    # ---- BatchNorm batch statistics, algebraically in plain JAX (no Pallas stats pass) ----
    # h = w1 x (+b1, which cancels) => mean_f = w1_f . E[x], var_f = w1_f^T Cov(x) w1_f.
    x_flat = xf.reshape(B * N, C_in)
    mean_x = jnp.mean(x_flat, axis=0)                                    # (C_in,)
    xc = x_flat - mean_x                                                 # centered -> no E[h^2]-m^2 cancellation
    cov_x = (xc.T @ xc) * (1.0 / float(B * N))                           # (C_in, C_in), biased
    mean_h = w1 @ mean_x                                                 # (F,)
    var_h = jnp.maximum(jnp.einsum('fc,cd,fd->f', w1, cov_x, w1), 0.0)   # (F,)
    scale_v = gamma * jax.lax.rsqrt(var_h + _BN_EPS)                     # (F,)
    shift_v = beta - mean_h * scale_v                                    # (F,)
    w1_folded = scale_v[:, None] * w1                                    # BN scale folded into conv1

    # ---- channels-first layout + pad N to a multiple of 128 (lane-dense, unmasked stores) ----
    x_t = jnp.transpose(xf, (0, 2, 1))                                   # (B, C_in, N)
    n_pad = ((N + 127) // 128) * 128
    if n_pad != N:
        x_t = jnp.pad(x_t, ((0, 0), (0, 0), (0, n_pad - N)))             # stats already exclude pad

    # Largest tile in {2048,...,128} dividing padded N; 2048 cap keeps the double-buffered VMEM
    # footprint (~8 MiB at F=256) safely under the scoped default on v5e/v6e/v7x.
    tn = max(t for t in (2048, 1024, 512, 256, 128) if n_pad % t == 0)
    grid = (B, n_pad // tn)

    w2_mx = w2.astype(jnp.bfloat16) if mxu_bf16 else w2
    out_itemsize = jnp.dtype(out_dtype).itemsize

    out = pl.pallas_call(
        _pos_embed_kernel,
        out_shape=jax.ShapeDtypeStruct((B, F, n_pad), out_dtype),
        grid=grid,
        in_specs=[
            pl.BlockSpec((None, C_in, tn), lambda b, j: (b, 0, j)),      # x tile
            pl.BlockSpec((F, C_in), lambda b, j: (0, 0)),                # w1 (BN-folded)
            pl.BlockSpec((F, 1), lambda b, j: (0, 0)),                   # shift
            pl.BlockSpec((F, F), lambda b, j: (0, 0)),                   # w2
            pl.BlockSpec((F, 1), lambda b, j: (0, 0)),                   # b2
        ],
        out_specs=pl.BlockSpec((None, F, tn), lambda b, j: (b, 0, j)),
        compiler_params=pltpu.CompilerParams(
            dimension_semantics=("parallel", "parallel")),               # megacore-shardable
        cost_estimate=pl.CostEstimate(
            flops=2 * B * n_pad * F * F + 2 * B * n_pad * F * C_in + 2 * B * n_pad * F,
            transcendentals=0,
            bytes_accessed=4 * B * n_pad * C_in
                           + out_itemsize * B * n_pad * F
                           + int(w2_mx.dtype.itemsize) * F * F
                           + 4 * (F * C_in + 2 * F)),
    )(x_t, w1_folded, shift_v.reshape(F, 1), w2_mx, b2.reshape(F, 1))

    if n_pad != N:
        out = out[:, :, :N]
    return out


def init_params(key, input_channel=3, num_pos_feats=256):
    """Parameters mirroring PositionEmbeddingLearned.__init__ (PyTorch native shapes, k=1 squeezed):
         conv1: w1 (F, C_in), b1 (F,)   [b1 kept for fidelity; cancelled by training-mode BN]
         bn:    gamma (F,), beta (F,)
         conv2: w2 (F, F),  b2 (F,)
    """
    k1, k2, k3, k4 = jax.random.split(key, 4)
    s1 = 1.0 / (input_channel ** 0.5)
    s2 = 1.0 / (num_pos_feats ** 0.5)
    w1 = jax.random.uniform(k1, (num_pos_feats, input_channel), jnp.float32, -s1, s1)
    b1 = jax.random.uniform(k2, (num_pos_feats,), jnp.float32, -s1, s1)
    gamma = jnp.ones((num_pos_feats,), jnp.float32)
    beta = jnp.zeros((num_pos_feats,), jnp.float32)
    w2 = jax.random.uniform(k3, (num_pos_feats, num_pos_feats), jnp.float32, -s2, s2)
    b2 = jax.random.uniform(k4, (num_pos_feats,), jnp.float32, -s2, s2)
    return (w1, b1, gamma, beta, w2, b2)


def _reference(xyz, params, eps=_BN_EPS):
    """Pure-JAX f32 reference of the PyTorch forward (training-mode BN, b1 included)."""
    w1, b1, gamma, beta, w2, b2 = params
    x = jnp.transpose(xyz, (0, 2, 1))                                    # (B, C, N)
    h = jnp.einsum('fc,bcn->bfn', w1, x) + b1[None, :, None]
    mean = jnp.mean(h, axis=(0, 2), keepdims=True)
    var = jnp.mean(jnp.square(h - mean), axis=(0, 2), keepdims=True)     # biased
    h = (h - mean) / jnp.sqrt(var + eps) * gamma[None, :, None] + beta[None, :, None]
    h = jnp.maximum(h, 0.0)
    return jnp.einsum('gf,bfn->bgn', w2, h) + b2[None, :, None]


if __name__ == "__main__":
    B, N, C_IN, F = 2, 256, 3, 256   # d_model = 256 in the module; N kept small

    key = jax.random.PRNGKey(0)
    k_x, k_p, k_x2 = jax.random.split(key, 3)
    xyz = jax.random.normal(k_x, (B, N, C_IN), dtype=jnp.float32)
    params = init_params(k_p, input_channel=C_IN, num_pos_feats=F)
    ref = _reference(xyz, params)

    # 1) full-f32 MXU path: tight tolerance
    out_f32 = jax.block_until_ready(
        position_embedding_learned(xyz, params, mxu_bf16=False))
    assert out_f32.shape == (B, F, N), out_f32.shape
    err_f32 = float(jnp.max(jnp.abs(out_f32 - ref)))
    assert err_f32 < 1e-3, f"f32 path max abs error {err_f32}"

    # 2) default bf16-MXU-operand path (f32 accumulation): looser tolerance
    out_bf = jax.block_until_ready(
        position_embedding_learned(xyz, params, mxu_bf16=True))
    err_bf = float(jnp.max(jnp.abs(out_bf - ref)))
    assert err_bf < 5e-2, f"bf16-MXU path max abs error {err_bf}"

    # 3) unaligned-N path (zero-pad to 128 multiple, slice back): stays lane-dense
    N2 = 200
    xyz2 = jax.random.normal(k_x2, (B, N2, C_IN), dtype=jnp.float32)
    out2 = jax.block_until_ready(
        position_embedding_learned(xyz2, params, mxu_bf16=False))
    assert out2.shape == (B, F, N2), out2.shape
    err2 = float(jnp.max(jnp.abs(out2 - _reference(xyz2, params))))
    assert err2 < 1e-3, f"padded path max abs error {err2}"

    print("KERNEL_OK")
</pallas_src>

<mosaic_0001>
module attributes {stable_mosaic.version = 11 : i64} {
  func.func @_pos_embed_kernel(%arg0: i32, %arg1: i32, %arg2: memref<1x3x256xf32, #tpu.memory_space<vmem>>, %arg3: memref<256x3xf32, #tpu.memory_space<vmem>>, %arg4: memref<256x1xf32, #tpu.memory_space<vmem>>, %arg5: memref<256x256xf32, #tpu.memory_space<vmem>>, %arg6: memref<256x1xf32, #tpu.memory_space<vmem>>, %arg7: memref<1x256x256xf32, #tpu.memory_space<vmem>>) attributes {dimension_semantics = [#tpu.dimension_semantics<parallel>, #tpu.dimension_semantics<parallel>], iteration_bounds = array<i64: 2, 1>, scalar_prefetch = 0 : i64, scratch_operands = 0 : i64, tpu.core_type = #tpu.core_type<tc>, window_params = [{transform_indices = @transform_0, window_bounds = array<i64: 1, 3, 256>}, {pipeline_mode = #tpu.pipeline_mode<synchronous>, transform_indices = @transform_1, window_bounds = array<i64: 256, 3>}, {pipeline_mode = #tpu.pipeline_mode<synchronous>, transform_indices = @transform_2, window_bounds = array<i64: 256, 1>}, {pipeline_mode = #tpu.pipeline_mode<synchronous>, transform_indices = @transform_3, window_bounds = array<i64: 256, 256>}, {pipeline_mode = #tpu.pipeline_mode<synchronous>, transform_indices = @transform_4, window_bounds = array<i64: 256, 1>}, {transform_indices = @transform_5, window_bounds = array<i64: 1, 256, 256>}]} {
    %c0 = arith.constant 0 : index
    %c0_0 = arith.constant 0 : index
    %c0_1 = arith.constant 0 : index
    %0 = vector.load %arg2[%c0, %c0_0, %c0_1] : memref<1x3x256xf32, #tpu.memory_space<vmem>>, vector<1x3x256xf32>
    %1 = vector.shape_cast %0 : vector<1x3x256xf32> to vector<3x256xf32>
    %c0_2 = arith.constant 0 : index
    %c0_3 = arith.constant 0 : index
    %2 = vector.load %arg4[%c0_2, %c0_3] : memref<256x1xf32, #tpu.memory_space<vmem>>, vector<256x1xf32>
    %c0_4 = arith.constant 0 : index
    %c0_5 = arith.constant 0 : index
    %3 = vector.load %arg3[%c0_4, %c0_5] : memref<256x3xf32, #tpu.memory_space<vmem>>, vector<256x1xf32>
    %4 = vector.extract_strided_slice %1 {offsets = [0, 0], sizes = [1, 256], strides = [1, 1]} : vector<3x256xf32> to vector<1x256xf32>
    %5 = vector.broadcast %3 : vector<256x1xf32> to vector<256x256xf32>
    %6 = vector.broadcast %4 : vector<1x256xf32> to vector<256x256xf32>
    %7 = arith.mulf %5, %6 : vector<256x256xf32>
    %8 = vector.broadcast %2 : vector<256x1xf32> to vector<256x256xf32>
    %9 = arith.addf %8, %7 : vector<256x256xf32>
    %c0_6 = arith.constant 0 : index
    %c1 = arith.constant 1 : index
    %10 = vector.load %arg3[%c0_6, %c1] : memref<256x3xf32, #tpu.memory_space<vmem>>, vector<256x1xf32>
    %11 = vector.extract_strided_slice %1 {offsets = [1, 0], sizes = [1, 256], strides = [1, 1]} : vector<3x256xf32> to vector<1x256xf32>
    %12 = vector.broadcast %10 : vector<256x1xf32> to vector<256x256xf32>
    %13 = vector.broadcast %11 : vector<1x256xf32> to vector<256x256xf32>
    %14 = arith.mulf %12, %13 : vector<256x256xf32>
    %15 = arith.addf %9, %14 : vector<256x256xf32>
    %c0_7 = arith.constant 0 : index
    %c2 = arith.constant 2 : index
    %16 = vector.load %arg3[%c0_7, %c2] : memref<256x3xf32, #tpu.memory_space<vmem>>, vector<256x1xf32>
    %17 = vector.extract_strided_slice %1 {offsets = [2, 0], sizes = [1, 256], strides = [1, 1]} : vector<3x256xf32> to vector<1x256xf32>
    %18 = vector.broadcast %16 : vector<256x1xf32> to vector<256x256xf32>
    %19 = vector.broadcast %17 : vector<1x256xf32> to vector<256x256xf32>
    %20 = arith.mulf %18, %19 : vector<256x256xf32>
    %21 = arith.addf %15, %20 : vector<256x256xf32>
    %cst = arith.constant 0.000000e+00 : f32
    %22 = vector.broadcast %cst : f32 to vector<256x256xf32>
    %23 = arith.maximumf %21, %22 : vector<256x256xf32>
    %c0_8 = arith.constant 0 : index
    %c0_9 = arith.constant 0 : index
    %24 = vector.load %arg5[%c0_8, %c0_9] : memref<256x256xf32, #tpu.memory_space<vmem>>, vector<256x256xf32>
    %cst_10 = arith.constant dense<0.000000e+00> : vector<256x256xf32>
    %25 = tpu.matmul %24, %23, %cst_10 {dimension_numbers = #tpu.dot_dimension_numbers<[1], [0], [0], [1], [0, 0, 1, 1], [], []>} : vector<256x256xf32>, vector<256x256xf32>, vector<256x256xf32> -> vector<256x256xf32>
    %c0_11 = arith.constant 0 : index
    %c0_12 = arith.constant 0 : index
    %26 = vector.load %arg6[%c0_11, %c0_12] : memref<256x1xf32, #tpu.memory_space<vmem>>, vector<256x1xf32>
    %27 = vector.broadcast %26 : vector<256x1xf32> to vector<256x256xf32>
    %28 = arith.addf %25, %27 : vector<256x256xf32>
    %c0_13 = arith.constant 0 : index
    %c0_14 = arith.constant 0 : index
    %c0_15 = arith.constant 0 : index
    %29 = vector.load %arg7[%c0_13, %c0_14, %c0_15] : memref<1x256x256xf32, #tpu.memory_space<vmem>>, vector<1x256x256xf32>
    %30 = vector.shape_cast %29 : vector<1x256x256xf32> to vector<256x256xf32>
    %31 = vector.shape_cast %28 : vector<256x256xf32> to vector<1x256x256xf32>
    tpu.vector_store %arg7[%c0_13, %c0_14, %c0_15], %31 {strides = array<i32>} : memref<1x256x256xf32, #tpu.memory_space<vmem>>, vector<1x256x256xf32>,
    return
  }
  func.func @transform_0(%arg0: i32, %arg1: i32) -> (i32, i32, i32) {
    %c0_i32 = arith.constant 0 : i32
    %c0_i32_0 = arith.constant 0 : i32
    return %arg0, %c0_i32, %arg1 : i32, i32, i32
  }
  func.func @transform_1(%arg0: i32, %arg1: i32) -> (i32, i32) {
    %c0_i32 = arith.constant 0 : i32
    %c0_i32_0 = arith.constant 0 : i32
    %c0_i32_1 = arith.constant 0 : i32
    return %c0_i32, %c0_i32_0 : i32, i32
  }
  func.func @transform_2(%arg0: i32, %arg1: i32) -> (i32, i32) {
    %c0_i32 = arith.constant 0 : i32
    %c0_i32_0 = arith.constant 0 : i32
    %c0_i32_1 = arith.constant 0 : i32
    return %c0_i32, %c0_i32_0 : i32, i32
  }
  func.func @transform_3(%arg0: i32, %arg1: i32) -> (i32, i32) {
    %c0_i32 = arith.constant 0 : i32
    %c0_i32_0 = arith.constant 0 : i32
    %c0_i32_1 = arith.constant 0 : i32
    return %c0_i32, %c0_i32_0 : i32, i32
  }
  func.func @transform_4(%arg0: i32, %arg1: i32) -> (i32, i32) {
    %c0_i32 = arith.constant 0 : i32
    %c0_i32_0 = arith.constant 0 : i32
    %c0_i32_1 = arith.constant 0 : i32
    return %c0_i32, %c0_i32_0 : i32, i32
  }
  func.func @transform_5(%arg0: i32, %arg1: i32) -> (i32, i32, i32) {
    %c0_i32 = arith.constant 0 : i32
    %c0_i32_0 = arith.constant 0 : i32
    return %arg0, %c0_i32, %arg1 : i32, i32, i32
  }
}

</mosaic_0001>

<bundles_post_ra>
// kernel: tpu_custom_call.1
= control target key start
LH: loop header
LB: loop body
LE: loop exit
PB: predicated region body
PF: predicated region fallthrough
CT: control target
= control target key end

     0   :  { %10 = vsyncpa [#allocation3], 0  ;;  %s3853_s0 = inlined_call_operand.vmem [shape: f32[2,3,256], index: 0, kind: input, shape index: {}]   ;;  %s3854_s1 = inlined_call_operand.vmem [shape: f32[256,3], index: 1, kind: input, shape index: {}]   ;;  %s3855_s2 = inlined_call_operand.vmem [shape: f32[256,1], index: 2, kind: input, shape index: {}]   ;;  %s3856_s3 = inlined_call_operand.vmem [shape: f32[256,256], index: 3, kind: input, shape index: {}]   ;;  %s3857_s4 = inlined_call_operand.vmem [shape: f32[256,1], index: 4, kind: input, shape index: {}]   ;;  %s3858_s5 = inlined_call_operand.hbm [shape: f32[2,256,256], index: 5, kind: output, shape index: {}]  }
   0x1   :  { %12 = vsyncpa [#allocation3 + $0x1], 0  ;;  %s2345_s18 = smov 0   ;;  %s2347_s19 = smov 0  }
   0x2   :  { %s2349_s20 = smov 0   ;;  %s2351_s21 = smov 0  }
   0x3   :  { %s2353_s22 = smov 0   ;;  %s2355_s23 = smov 0  }
   0x4 LB: > { %s2070_s24 = sadd.s32 4294967295, %s2307_s23   ;;  %s2071_s25 = sadd.s32 4294967294, %s2307_s23   ;;  %s2307_s23 = sphi %s2355_s23, %s18_s23   ;;  %s2303_s22 = sphi %s2353_s22, %s3982_s22   ;;  %s2299_s21 = sphi %s2351_s21, %s3981_s21   ;;  %s2295_s20 = sphi %s2349_s20, %s3980_s20   ;;  %s2291_s19 = sphi %s2347_s19, %s3979_s19   ;;  %s2287_s18 = sphi %s2345_s18, %s3978_s18  }
   0x5   : > { %s30_s26 = sadd.s32 1, %s2303_s22  ;;  %s151_s27 = sadd.s32 1, %s2295_s20 }
   0x6   : > { %p32_p0 = scmp.ge.s32.totalorder %s30_s26, 2  ;;  %p161_p1 = scmp.ne.s32.totalorder %s2295_s20, %s2291_s19 }
   0x7   : > { %p162_p2 = scmp.eq.s32.totalorder %s2070_s24, 1  ;;  %p167_p3 = scmp.ne.s32.totalorder %s2291_s19, %s2287_s18 }
   0x8   : > { %s3984_s26 = smov (%p32_p0, %s30_s26), 0  ;;  %p168_p5 = scmp.eq.s32.totalorder %s2071_s25, 1 }
   0x9   : > { %p2385_p4 = por %p162_p2, %p161_p1  ;;  %s146_s29 = ssub.s32 %s2303_s22, %s3984_s26 }
   0xa   : > { %p2074_p6 = scmp.ge.s32.totalorder %s2307_s23, 1  ;;  %p149_p7 = scmp.eq.s32.totalorder %s146_s29, 0 }
   0xb   : > { %p2392_p8 = por %p168_p5, %p167_p3  ;;  %p211_p9 = scmp.lt.s32.totalorder %s2307_s23, 3 }
   0xc   : > { %s2398_s6 = scalar_select %p149_p7, %s2295_s20, %s151_s27  }
   0xd   : > { %p212_p10 = pnand %p2074_p6, %p211_p9 }
   0xf   : > { %215 = sbr.rel (%p212_p10) target bundleno = 715 (0x2cb), region = 40 }
  0x14   : > { %v2403_v0 = vld [vmem:[%s3854_s1 + $0x10] sm:$0xff]  ;;  %v2408_v1 = vld [vmem:[%s3854_s1] sm:$0xff]  ;;  %v3859_v2 = vmov 0   ;;  %v2417_v3 = vld [vmem:[%s3854_s1 + $0x18] sm:$0xff]  ;;  %p244_p11 = scmp.lt.s32.totalorder %s2299_s21, 1  ;;  %s240_s17 = sand.u32 1, %s2291_s19  }
  0x15   : > { %2210 = vset.pattern.permute.xlu1 %v3859_v2  ;;  %2209 = vset.pattern.permute.xlu0 %v3859_v2  ;;  %v2422_v4 = vld [vmem:[%s3854_s1 + $0x8] sm:$0xff]  ;;  %v2434_v6 = vld [vmem:[%s3854_s1 + $0x20] sm:$0xff]  ;;  %v2441_v7 = vld [vmem:[%s3854_s1 + $0x38] sm:$0xff]  ;;  %s2075_s24 = sshll.u32 %s240_s17, 9  ;;  %s2084_s27 = sshll.u32 %s2299_s21, 13 }
  0x16   : > { %331 = vperm.xlu1 %2210, %v2403_v0   ;;  %321 = vperm.xlu0 %2209, %v2408_v1   ;;  %v2429_v5 = vld [vmem:[%s3854_s1 + $0x28] sm:$0xff]  ;;  %v2446_v8 = vld [vmem:[%s3854_s1 + $0x30] sm:$0xff]  ;;  %v2458_v10 = vld [vmem:[%s3854_s1 + $0x40] sm:$0xff]  ;;  %s245_s15 = scalar_select %p244_p11, %s2299_s21, 1 }
  0x17   : > { %v2453_v9 = vld [vmem:[%s3854_s1 + $0x48] sm:$0xff]  ;;  %v2465_v11 = vld [vmem:[%s3854_s1 + $0x58] sm:$0xff]  ;;  %v2470_v12 = vld [vmem:[%s3854_s1 + $0x50] sm:$0xff]  ;;  %s3797_s9 = scalar_lea.hbm %s3858_s5, %s2084_s27  ;;  %s3808_s21 = scalar_lea.sflag [#allocation3], %s240_s17 }
  0x18   : > { %v2477_v13 = vld [vmem:[%s3854_s1 + $0x68] sm:$0xff]  ;;  %v2482_v14 = vld [vmem:[%s3854_s1 + $0x60] sm:$0xff]  ;;  %v2489_v15 = vld [vmem:[%s3854_s1 + $0x78] sm:$0xff]  ;;  %s2083_s16 = sshll.u32 %s245_s15, 3  ;;  %s2312_s11 = smov [#allocation2]  }
  0x19   : > { %v2494_v16 = vld [vmem:[%s3854_s1 + $0x70] sm:$0xff]  ;;  %v2501_v17 = vld [vmem:[%s3854_s1 + $0x88] sm:$0xff]  ;;  %v2506_v18 = vld [vmem:[%s3854_s1 + $0x80] sm:$0xff]  ;;  %s251_s25 = scalar_lea.vmem %s3853_s0, %s2083_s16  ;;  %s2235_s12 = sshll.u32 %s2312_s11, 4  ;;  %s2236_s12 = int_to_ptr.vmem [resolvable:$false] %s2235_s12 }
  0x1a   : > { %336 = vperm.xlu1 %2210, %v2417_v3   ;;  %326 = vperm.xlu0 %2209, %v2422_v4   ;;  %v2513_v19 = vld [vmem:[%s3854_s1 + $0x98] sm:$0xff]  ;;  %v2518_v20 = vld [vmem:[%s3854_s1 + $0x90] sm:$0xff]  ;;  %v2525_v21 = vld [vmem:[%s3854_s1 + $0xa8] sm:$0xff]  ;;  %s2237_s13 = scalar_lea.vmem %s2236_s12, 16384 }
  0x1b   : > { %v2530_v22 = vld [vmem:[%s3854_s1 + $0xa0] sm:$0xff]  ;;  %v2537_v23 = vld [vmem:[%s3854_s1 + $0xb8] sm:$0xff]  ;;  %v2542_v24 = vld [vmem:[%s3854_s1 + $0xb0] sm:$0xff] }
  0x1c   : > { %v2549_v25 = vld [vmem:[%s3854_s1 + $0xc8] sm:$0xff]  ;;  %v2554_v26 = vld [vmem:[%s3854_s1 + $0xc0] sm:$0xff]  ;;  %v2561_v27 = vld [vmem:[%s3854_s1 + $0xd8] sm:$0xff] }
  0x1d   : > { %v2566_v28 = vld [vmem:[%s3854_s1 + $0xd0] sm:$0xff]  ;;  %v2573_v29 = vld [vmem:[%s3854_s1 + $0xe8] sm:$0xff]  ;;  %v2578_v30 = vld [vmem:[%s3854_s1 + $0xe0] sm:$0xff] }
  0x1e   : > { %346 = vperm.xlu1 %2210, %v2429_v5   ;;  %341 = vperm.xlu0 %2209, %v2434_v6   ;;  %v2585_v31 = vld [vmem:[%s3854_s1 + $0xf8] sm:$0xff]  ;;  %v2590_v32 = vld [vmem:[%s3854_s1 + $0xf0] sm:$0xff]  ;;  %v256_v33 = vld [vmem:[%s3855_s2 + $0x8] sm:$0xff] }
  0x1f   : > { %v255_v34 = vld [vmem:[%s3855_s2] sm:$0xff]  ;;  %v258_v35 = vld [vmem:[%s3855_s2 + $0x18] sm:$0xff]  ;;  %v257_v36 = vld [vmem:[%s3855_s2 + $0x10] sm:$0xff] }
  0x20   : > { %v260_v37 = vld [vmem:[%s3855_s2 + $0x28] sm:$0xff]  ;;  %v259_v38 = vld [vmem:[%s3855_s2 + $0x20] sm:$0xff]  ;;  %v262_v39 = vld [vmem:[%s3855_s2 + $0x38] sm:$0xff] }
  0x21   : > { %v261_v40 = vld [vmem:[%s3855_s2 + $0x30] sm:$0xff]  ;;  %v264_v41 = vld [vmem:[%s3855_s2 + $0x48] sm:$0xff]  ;;  %v263_v42 = vld [vmem:[%s3855_s2 + $0x40] sm:$0xff] }
  0x22   : > { %356 = vperm.xlu1 %2210, %v2441_v7   ;;  %351 = vperm.xlu0 %2209, %v2446_v8   ;;  %v266_v43 = vld [vmem:[%s3855_s2 + $0x58] sm:$0xff]  ;;  %v265_v44 = vld [vmem:[%s3855_s2 + $0x50] sm:$0xff]  ;;  %v268_v45 = vld [vmem:[%s3855_s2 + $0x68] sm:$0xff] }
  0x23   : > { %v267_v46 = vld [vmem:[%s3855_s2 + $0x60] sm:$0xff]  ;;  %v270_v47 = vld [vmem:[%s3855_s2 + $0x78] sm:$0xff]  ;;  %v269_v48 = vld [vmem:[%s3855_s2 + $0x70] sm:$0xff] }
  0x24   : > { %v272_v49 = vld [vmem:[%s3855_s2 + $0x88] sm:$0xff]  ;;  %v271_v50 = vld [vmem:[%s3855_s2 + $0x80] sm:$0xff]  ;;  %v274_v51 = vld [vmem:[%s3855_s2 + $0x98] sm:$0xff] }
  0x25   : > { %v273_v52 = vld [vmem:[%s3855_s2 + $0x90] sm:$0xff]  ;;  %v276_v53 = vld [vmem:[%s3855_s2 + $0xa8] sm:$0xff]  ;;  %v275_v54 = vld [vmem:[%s3855_s2 + $0xa0] sm:$0xff] }
  0x26   : > { %366 = vperm.xlu1 %2210, %v2453_v9   ;;  %361 = vperm.xlu0 %2209, %v2458_v10   ;;  %v278_v55 = vld [vmem:[%s3855_s2 + $0xb8] sm:$0xff]  ;;  %v277_v56 = vld [vmem:[%s3855_s2 + $0xb0] sm:$0xff]  ;;  %v280_v57 = vld [vmem:[%s3855_s2 + $0xc8] sm:$0xff] }
  0x27   : > { %v279_v58 = vld [vmem:[%s3855_s2 + $0xc0] sm:$0xff]  ;;  %v282_v59 = vld [vmem:[%s3855_s2 + $0xd8] sm:$0xff]  ;;  %v281_v60 = vld [vmem:[%s3855_s2 + $0xd0] sm:$0xff] }
  0x28   : > { %v284_v61 = vld [vmem:[%s3855_s2 + $0xe8] sm:$0xff]  ;;  %v283_v62 = vld [vmem:[%s3855_s2 + $0xe0] sm:$0xff]  ;;  %v286_v63 = vld [vmem:[%s3855_s2 + $0xf8] sm:$0xff] }
  0x2a   : > { %376 = vperm.xlu1 %2210, %v2465_v11   ;;  %371 = vperm.xlu0 %2209, %v2470_v12  }
  0x2e   : > { %386 = vperm.xlu1 %2210, %v2477_v13   ;;  %381 = vperm.xlu0 %2209, %v2482_v14  }
  0x32   : > { %396 = vperm.xlu1 %2210, %v2489_v15   ;;  %391 = vperm.xlu0 %2209, %v2494_v16  }
  0x36   : > { %406 = vperm.xlu1 %2210, %v2501_v17   ;;  %401 = vperm.xlu0 %2209, %v2506_v18  }
  0x3a   : > { %416 = vperm.xlu1 %2210, %v2513_v19   ;;  %411 = vperm.xlu0 %2209, %v2518_v20  }
  0x3e   : > { %426 = vperm.xlu1 %2210, %v2525_v21   ;;  %421 = vperm.xlu0 %2209, %v2530_v22  }
  0x42   : > { %436 = vperm.xlu1 %2210, %v2537_v23   ;;  %431 = vperm.xlu0 %2209, %v2542_v24  }
  0x46   : > { %446 = vperm.xlu1 %2210, %v2549_v25   ;;  %441 = vperm.xlu0 %2209, %v2554_v26  }
  0x4a   : > { %456 = vperm.xlu1 %2210, %v2561_v27   ;;  %451 = vperm.xlu0 %2209, %v2566_v28  }
  0x4e   : > { %466 = vperm.xlu1 %2210, %v2573_v29   ;;  %461 = vperm.xlu0 %2209, %v2578_v30  }
  0x52   : > { %476 = vperm.xlu1 %2210, %v2585_v31   ;;  %471 = vperm.xlu0 %2209, %v2590_v32  }
  0x56   : > { %569 = vperm.xlu1 %2210, %v256_v33   ;;  %564 = vperm.xlu0 %2209, %v255_v34  }
  0x5a   : > { %579 = vperm.xlu1 %2210, %v258_v35   ;;  %574 = vperm.xlu0 %2209, %v257_v36   ;;  %v3861_v35 = vmov 1   ;;  %v285_v36 = vld [vmem:[%s3855_s2 + $0xf0] sm:$0xff] }
  0x5e   : > { %589 = vperm.xlu1 %2210, %v260_v37   ;;  %584 = vperm.xlu0 %2209, %v259_v38  }
  0x62   : > { %599 = vperm.xlu1 %2210, %v262_v39   ;;  %594 = vperm.xlu0 %2209, %v261_v40   ;;  %v3864_v39 = vmov 2  }
  0x66   : > { %609 = vperm.xlu1 %2210, %v264_v41   ;;  %604 = vperm.xlu0 %2209, %v263_v42  }
  0x6a   : > { %619 = vperm.xlu1 %2210, %v266_v43   ;;  %614 = vperm.xlu0 %2209, %v265_v44  }
  0x6e   : > { %629 = vperm.xlu1 %2210, %v268_v45   ;;  %624 = vperm.xlu0 %2209, %v267_v46  }
  0x72   : > { %639 = vperm.xlu1 %2210, %v270_v47   ;;  %634 = vperm.xlu0 %2209, %v269_v48  }
  0x76   : > { %649 = vperm.xlu1 %2210, %v272_v49   ;;  %644 = vperm.xlu0 %2209, %v271_v50  }
  0x7a   : > { %659 = vperm.xlu1 %2210, %v274_v51   ;;  %654 = vperm.xlu0 %2209, %v273_v52  }
  0x7e   : > { %669 = vperm.xlu1 %2210, %v276_v53   ;;  %664 = vperm.xlu0 %2209, %v275_v54  }
  0x82   : > { %679 = vperm.xlu1 %2210, %v278_v55   ;;  %674 = vperm.xlu0 %2209, %v277_v56  }
  0x86   : > { %689 = vperm.xlu1 %2210, %v280_v57   ;;  %684 = vperm.xlu0 %2209, %v279_v58  }
  0x8a   : > { %699 = vperm.xlu1 %2210, %v282_v59   ;;  %694 = vperm.xlu0 %2209, %v281_v60  }
  0x8e   : > { %709 = vperm.xlu1 %2210, %v284_v61   ;;  %704 = vperm.xlu0 %2209, %v283_v62   ;;  %v480_v62 = vlaneseq }
  0x91   : > { %v2687_v33 = vpop.permute.xlu1 %331  ;;  %v2689_v34 = vpop.permute.xlu0 %321 }
  0x92   : > { %2211 = vset.pattern.permute.xlu1 %v3861_v35  ;;  %719 = vperm.xlu0 %2209, %v286_v63  }
  0x93   : > { %843 = vperm.xlu1 %2211, %v2494_v16  }
  0x95   : > { %v2696_v37 = vpop.permute.xlu1 %336  ;;  %v2698_v38 = vpop.permute.xlu0 %326 }
  0x96   : > { %714 = vperm.xlu0 %2209, %v285_v36   ;;  %v2826_v36 = vshrl.u32 %v480_v62, 7  ;;  %v2840_v62 = vld [vmem:[%s251_s25] sm:$0x77]  ;;  %s3705_s25 = scalar_lea.vmem [#allocation2], %s2075_s24 }
  0x97   : > { %2212 = vset.pattern.permute.xlu1 %v3864_v39  ;;  %s1991_s29 = sshll.u32 %s3705_s25, 4  ;;  %s3799_s29 = int_to_ptr.vmem [resolvable:$true] %s1991_s29 }
  0x98   : > { %1121 = vperm.xlu1 %2212, %v2489_v15   ;;  %s2231_s10 = scalar_lea.vmem %s3799_s29, 8192  ;;  %p2238_p1 = scmp.lt.s32.totalorder %s3799_s29, %s2236_s12 }
  0x99   : > { %v2702_v40 = vpop.permute.xlu1 %346  ;;  %v2704_v41 = vpop.permute.xlu0 %341  ;;  %p2232_p12 = scmp.ne.s32.totalorder %s3799_s29, %s2231_s10  ;;  %p2239_p2 = scmp.lt.s32.totalorder %s2237_s13, %s2231_s10 }
  0x9a   : > { %2216 = vset.pattern.permute.xlu0 %v3864_v39 }
  0x9b   : > { %1185 = vperm.xlu0 %2216, %v2585_v31   ;;  %p2233_p13 = pnand %p2232_p12, %p2385_p4  ;;  %p2240_p3 = por %p2239_p2, %p2238_p1 }
  0x9c   : > { %1117 = vperm.xlu1 %2212, %v2494_v16  }
  0x9d   : > { %v2709_v42 = vpop.permute.xlu1 %356  ;;  %v2711_v43 = vpop.permute.xlu0 %351  ;;  %p2234_p0 = pneg %p2233_p13 }
  0x9f   : > { %1173 = vperm.xlu0 %2216, %v2578_v30   ;;  %p2241_p5 = pnand %p2240_p3, %p2234_p0 }
  0xa0   : > { %1113 = vperm.xlu1 %2212, %v2477_v13  }
  0xa1   : > { %v2715_v44 = vpop.permute.xlu1 %366  ;;  %v2717_v45 = vpop.permute.xlu0 %361 }
  0xa3   : > { %2219 = vset.pattern.permute.xlu0 %v3861_v35 }
  0xa4   : > { %1109 = vperm.xlu1 %2212, %v2482_v14   ;;  %847 = vperm.xlu0 %2219, %v2489_v15  }
  0xa5   : > { %v2722_v46 = vpop.permute.xlu1 %376  ;;  %v2724_v16 = vpop.permute.xlu0 %371 }
  0xa8   : > { %1105 = vperm.xlu1 %2212, %v2465_v11   ;;  %839 = vperm.xlu0 %2219, %v2477_v13  }
  0xa9   : > { %v2728_v47 = vpop.permute.xlu1 %386  ;;  %v2730_v48 = vpop.permute.xlu0 %381 }
  0xac   : > { %1101 = vperm.xlu1 %2212, %v2470_v12   ;;  %835 = vperm.xlu0 %2219, %v2482_v14  }
  0xad   : > { %v2734_v49 = vpop.permute.xlu1 %396  ;;  %v2736_v50 = vpop.permute.xlu0 %391 }
  0xb0   : > { %1097 = vperm.xlu1 %2212, %v2453_v9   ;;  %831 = vperm.xlu0 %2219, %v2465_v11  }
  0xb1   : > { %v2740_v15 = vpop.permute.xlu1 %406  ;;  %v2742_v51 = vpop.permute.xlu0 %401 }
  0xb2   : > { %3889 = vst [vmem:[#allocation5_spill] sm:$0xff] %v2740_v15  ;;  %3890 = vst [vmem:[#allocation6_spill] sm:$0xff] %v2742_v51  ;;  %v486_v51 = vsub.s32 4, %v2826_v36 }
  0xb4   : > { %1093 = vperm.xlu1 %2212, %v2458_v10   ;;  %827 = vperm.xlu0 %2219, %v2470_v12  }
  0xb5   : > { %v2746_v13 = vpop.permute.xlu1 %416  ;;  %v2748_v52 = vpop.permute.xlu0 %411 }
  0xb6   : > { %3891 = vst [vmem:[#allocation7_spill] sm:$0xff] %v2746_v13  ;;  %v487_v13 = vrot.slane %v2840_v62, %v486_v51 }
  0xb8   : > { %1089 = vperm.xlu1 %2212, %v2441_v7   ;;  %823 = vperm.xlu0 %2219, %v2453_v9  }
  0xb9   : > { %v2752_v14 = vpop.permute.xlu1 %426  ;;  %v2754_v53 = vpop.permute.xlu0 %421 }
  0xba   : > { %3892 = vst [vmem:[#allocation8_spill] sm:$0xff] %v2752_v14  ;;  %v3900_v14 = vmov 1  }
  0xbc   : > { %1085 = vperm.xlu1 %2212, %v2446_v8   ;;  %819 = vperm.xlu0 %2219, %v2458_v10  }
  0xbd   : > { %v2758_v11 = vpop.permute.xlu1 %436  ;;  %v2760_v54 = vpop.permute.xlu0 %431 }
  0xbe   : > { %3893 = vst [vmem:[#allocation9_spill] sm:$0xff] %v2758_v11  ;;  %v3901_v11 = vmov 2  }
  0xc0   : > { %1081 = vperm.xlu1 %2212, %v2429_v5   ;;  %815 = vperm.xlu0 %2219, %v2441_v7  }
  0xc1   : > { %v2764_v12 = vpop.permute.xlu1 %446  ;;  %v2766_v55 = vpop.permute.xlu0 %441 }
  0xc2   : > { %3894 = vst [vmem:[#allocation10_spill] sm:$0xff] %v2764_v12 }
  0xc4   : > { %1077 = vperm.xlu1 %2212, %v2434_v6   ;;  %811 = vperm.xlu0 %2219, %v2446_v8  }
  0xc5   : > { %v2770_v9 = vpop.permute.xlu1 %456  ;;  %v2772_v56 = vpop.permute.xlu0 %451 }
  0xc6   : > { %3895 = vst [vmem:[#allocation11_spill] sm:$0xff] %v2770_v9 }
  0xc8   : > { %1073 = vperm.xlu1 %2212, %v2417_v3   ;;  %807 = vperm.xlu0 %2219, %v2429_v5  }
  0xc9   : > { %v2776_v10 = vpop.permute.xlu1 %466  ;;  %v2778_v57 = vpop.permute.xlu0 %461 }
  0xca   : > { %3896 = vst [vmem:[#allocation12_spill] sm:$0xff] %v2776_v10 }
  0xcc   : > { %1069 = vperm.xlu1 %2212, %v2403_v0   ;;  %803 = vperm.xlu0 %2219, %v2434_v6  }
  0xcd   : > { %v2782_v7 = vpop.permute.xlu1 %476  ;;  %v2784_v8 = vpop.permute.xlu0 %471 }
  0xd0   : > { %1065 = vperm.xlu1 %2212, %v2422_v4   ;;  %799 = vperm.xlu0 %2219, %v2417_v3  }
  0xd1   : > { %v2788_v58 = vpop.permute.xlu1 %569  ;;  %v2790_v5 = vpop.permute.xlu0 %564 }
  0xd2   : > { %3897 = vst [vmem:[#allocation13_spill] sm:$0xff] %v2790_v5 }
  0xd4   : > { %2213 = vset.pattern.permute.xlu1 %v3861_v35  ;;  %795 = vperm.xlu0 %2219, %v2403_v0  }
  0xd5   : > { %911 = vperm.xlu1 %2213, %v2585_v31   ;;  %v2795_v6 = vpop.permute.xlu1 %579  ;;  %v2797_v59 = vpop.permute.xlu0 %574 }
  0xd6   : > { %3898 = vst [vmem:[#allocation14_spill] sm:$0xff] %v2795_v6  ;;  %3899 = vst [vmem:[#allocation15_spill] sm:$0xff] %v2797_v59 }
  0xd8   : > { %791 = vperm.xlu0 %2219, %v2422_v4  }
  0xd9   : > { %2214 = vset.pattern.permute.xlu1 %v3864_v39  ;;  %v2801_v3 = vpop.permute.xlu1 %589  ;;  %v2803_v60 = vpop.permute.xlu0 %584 }
  0xda   : > { %1061 = vperm.xlu1 %2214, %v2408_v1  }
  0xdc   : > { %787 = vperm.xlu0 %2219, %v2408_v1  }
  0xdd   : > { %v2808_v0 = vpop.permute.xlu1 %599  ;;  %v2810_v31 = vpop.permute.xlu0 %594 }
  0xde   : > { %2215 = vset.pattern.permute.xlu1 %v3861_v35  ;;  %v482_v35 = vsub.s32 0, %v2826_v36 }
  0xdf   : > { %907 = vperm.xlu1 %2215, %v2590_v32  }
  0xe0   : > { %899 = vperm.xlu0 %2219, %v2578_v30   ;;  %v2859_v10 = vrot.slane %v487_v13, %v482_v35 }
  0xe1   : > { %v2816_v4 = vpop.permute.xlu1 %609  ;;  %v2818_v61 = vpop.permute.xlu0 %604 }
  0xe2   : > { %v535_v51 = vmul.f32 %v2859_v10, %v2748_v52 }
  0xe3   : > { %903 = vperm.xlu1 %2215, %v2573_v29  }
  0xe4   : > { %887 = vperm.xlu0 %2219, %v2549_v25  }
  0xe5   : > { %v2822_v1 = vpop.permute.xlu1 %619  ;;  %v2824_v63 = vpop.permute.xlu0 %614 }
  0xe7   : > { %2217 = vset.pattern.permute.xlu1 %v3864_v39 }
  0xe8   : > { %1181 = vperm.xlu1 %2217, %v2590_v32   ;;  %875 = vperm.xlu0 %2219, %v2542_v24   ;;  %v483_v32 = vrot.slane %v2840_v62, %v482_v35 }
  0xe9   : > { %v2834_v30 = vpop.permute.xlu1 %629  ;;  %v2836_v2 = vpop.permute.xlu0 %624 }
  0xec   : > { %1177 = vperm.xlu1 %2217, %v2573_v29   ;;  %863 = vperm.xlu0 %2219, %v2513_v19   ;;  %v2857_v29 = vrot.slane %v483_v32, %v482_v35  ;;  %v539_v35 = vmul.f32 %v2859_v10, %v2754_v53 }
  0xed   : > { %v2844_v39 = vpop.permute.xlu1 %639  ;;  %v2846_v15 = vpop.permute.xlu0 %634 }
  0xee   : > { %v534_v59 = vmul.f32 %v2857_v29, %v2748_v52 }
  0xf0   : > { %2218 = vset.pattern.permute.xlu1 %v3900_v14  ;;  %2225 = vset.pattern.permute.xlu0 %v3901_v11 }
  0xf1   : > { %895 = vperm.xlu1 %2218, %v2561_v27   ;;  %v2853_v12 = vpop.permute.xlu1 %649  ;;  %v2855_v9 = vpop.permute.xlu0 %644  ;;  %1161 = vperm.xlu0 %2225, %v2549_v25   ;;  %v538_v25 = vmul.f32 %v2857_v29, %v2754_v53 }
  0xf2   : > { %3902 = vst [vmem:[#allocation16_spill] sm:$0xff] %v2853_v12  ;;  %3903 = vst [vmem:[#allocation17_spill] sm:$0xff] %v2855_v9 }
  0xf5   : > { %891 = vperm.xlu1 %2218, %v2566_v28   ;;  %v2867_v6 = vpop.permute.xlu1 %659  ;;  %v655_v5 = vpop.permute.xlu0 %654  ;;  %1149 = vperm.xlu0 %2225, %v2542_v24  }
  0xf6   : > { %3904 = vst [vmem:[#allocation18_spill] sm:$0xff] %v2867_v6  ;;  %v2870_v9 = vadd.f32 %v655_v5, %v534_v59  ;;  %v2872_v32 = vadd.f32 %v655_v5, %v535_v51  ;;  %v542_v5 = vmul.f32 %v2857_v29, %v2760_v54  ;;  %v543_v59 = vmul.f32 %v2859_v10, %v2760_v54 }
  0xf8   : > { %3905 = vst [vmem:[#allocation19_spill] sm:$0xff] %v2870_v9  ;;  %3906 = vst [vmem:[#allocation20_spill] sm:$0xff] %v2872_v32 }
  0xf9   : > { %2220 = vset.pattern.permute.xlu1 %v3901_v11  ;;  %v2879_v13 = vpop.permute.xlu1 %669  ;;  %v665_v52 = vpop.permute.xlu0 %664  ;;  %1137 = vperm.xlu0 %2225, %v2513_v19  }
  0xfa   : > { %3907 = vst [vmem:[#allocation21_spill] sm:$0xff] %v2879_v13  ;;  %v2882_v12 = vadd.f32 %v665_v52, %v538_v25  ;;  %v2884_v24 = vadd.f32 %v665_v52, %v539_v35  ;;  %1169 = vperm.xlu1 %2220, %v2561_v27   ;;  %v546_v27 = vmul.f32 %v2857_v29, %v2766_v55 }
  0xfb   : > { %v547_v25 = vmul.f32 %v2859_v10, %v2766_v55 }
  0xfc   : > { %3908 = vst [vmem:[#allocation22_spill] sm:$0xff] %v2882_v12  ;;  %3909 = vst [vmem:[#allocation23_spill] sm:$0xff] %v2884_v24 }
  0xfd   : > { %v2891_v53 = vpop.permute.xlu1 %679  ;;  %v675_v51 = vpop.permute.xlu0 %674  ;;  %2228 = vset.pattern.permute.xlu0 %v3900_v14 }
  0xfe   : > { %3910 = vst [vmem:[#allocation24_spill] sm:$0xff] %v2891_v53  ;;  %v2894_v32 = vadd.f32 %v675_v51, %v542_v5  ;;  %v2896_v19 = vadd.f32 %v675_v51, %v543_v59  ;;  %1165 = vperm.xlu1 %2220, %v2566_v28   ;;  %851 = vperm.xlu0 %2228, %v2506_v18   ;;  %v3916_v5 = vmov 0   ;;  %v1190_v53 = vsub.s32 2, %v2826_v36 }
  0xff   : > { %v550_v28 = vmul.f32 %v2857_v29, %v2772_v56  ;;  %v551_v59 = vmul.f32 %v2859_v10, %v2772_v56 }
 0x100   : > { %3911 = vst [vmem:[#allocation25_spill] sm:$0xff] %v2894_v32  ;;  %3912 = vst [vmem:[#allocation26_spill] sm:$0xff] %v2896_v19 }
 0x101   : > { %v2904_v54 = vpop.permute.xlu1 %689  ;;  %v685_v35 = vpop.permute.xlu0 %684 }
 0x102   : > { %3913 = vst [vmem:[#allocation27_spill] sm:$0xff] %v2904_v54  ;;  %v2906_v52 = vadd.f32 %v685_v35, %v546_v27  ;;  %v2908_v9 = vadd.f32 %v685_v35, %v547_v25  ;;  %2221 = vset.pattern.permute.xlu1 %v3900_v14  ;;  %2229 = vset.pattern.permute.xlu0 %v3916_v5 }
 0x103   : > { %883 = vperm.xlu1 %2221, %v2554_v26   ;;  %v554_v25 = vmul.f32 %v2857_v29, %v2778_v57  ;;  %v555_v35 = vmul.f32 %v2859_v10, %v2778_v57  ;;  %v559_v57 = vmul.f32 %v2859_v10, %v2784_v8 }
 0x104   : > { %3914 = vst [vmem:[#allocation28_spill] sm:$0xff] %v2906_v52  ;;  %3915 = vst [vmem:[#allocation29_spill] sm:$0xff] %v2908_v9  ;;  %v1194_v9 = vsub.s32 6, %v2826_v36 }
 0x105   : > { %v2917_v55 = vpop.permute.xlu1 %699  ;;  %v695_v51 = vpop.permute.xlu0 %694 }
 0x106   : > { %3917 = vst [vmem:[#allocation30_spill] sm:$0xff] %v2917_v55  ;;  %v2919_v24 = vadd.f32 %v695_v51, %v550_v28  ;;  %v2921_v27 = vadd.f32 %v695_v51, %v551_v59  ;;  %v558_v51 = vmul.f32 %v2857_v29, %v2784_v8  ;;  %v2972_v55 = vmul.f32 %v2859_v10, %v2687_v33 }
 0x107   : > { %879 = vperm.xlu1 %2221, %v2537_v23  }
 0x108   : > { %3918 = vst [vmem:[#allocation31_spill] sm:$0xff] %v2919_v24  ;;  %3919 = vst [vmem:[#allocation32_spill] sm:$0xff] %v2921_v27 }
 0x109   : > { %v2928_v12 = vpop.permute.xlu1 %709  ;;  %v705_v56 = vpop.permute.xlu0 %704  ;;  %3929 = vst [vmem:[#allocation42_spill] sm:$0xff] %v2972_v55 }
 0x10a   : > { %3920 = vst [vmem:[#allocation33_spill] sm:$0xff] %v2928_v12  ;;  %v2930_v6 = vadd.f32 %v705_v56, %v554_v25  ;;  %v2932_v13 = vadd.f32 %v705_v56, %v555_v35  ;;  %v920_v25 = vsub.s32 5, %v2826_v36  ;;  %v916_v35 = vsub.s32 1, %v2826_v36 }
 0x10b   : > { %2222 = vset.pattern.permute.xlu1 %v3901_v11  ;;  %v2964_v36 = vmul.f32 %v2857_v29, %v2687_v33  ;;  %v2994_v33 = vmul.f32 %v2857_v29, %v2698_v38 }
 0x10c   : > { %3921 = vst [vmem:[#allocation34_spill] sm:$0xff] %v2930_v6  ;;  %3922 = vst [vmem:[#allocation35_spill] sm:$0xff] %v2932_v13  ;;  %1157 = vperm.xlu1 %2222, %v2554_v26   ;;  %v921_v8 = vrot.slane %v2840_v62, %v920_v25  ;;  %v526_v6 = vmul.f32 %v2857_v29, %v2736_v50 }
 0x10d   : > { %v2936_v28 = vpop.permute.xlu0 %719  ;;  %3927 = vst [vmem:[#allocation40_spill] sm:$0xff] %v2964_v36  ;;  %v525_v36 = vmul.f32 %v2859_v10, %v2728_v47 }
 0x10e   : > { %3923 = vst [vmem:[#allocation36_spill] sm:$0xff] %v2936_v28  ;;  %v844_v59 = vpop.permute.xlu1 %843 }
 0x110   : > { %1153 = vperm.xlu1 %2222, %v2537_v23   ;;  %v917_v23 = vrot.slane %v2840_v62, %v916_v35 }
 0x111   : > { %v715_v32 = vpop.permute.xlu0 %714 }
 0x112   : > { %v2945_v56 = vadd.f32 %v715_v32, %v558_v51  ;;  %v2947_v19 = vadd.f32 %v715_v32, %v559_v57  ;;  %v1191_v51 = vrot.slane %v2840_v62, %v1190_v53  ;;  %v1195_v32 = vrot.slane %v2840_v62, %v1194_v9 }
 0x113   : > { %v1122_v26 = vpop.permute.xlu1 %1121  ;;  %v2959_v57 = vrot.slane %v921_v8, %v916_v35  ;;  %v2966_v25 = vrot.slane %v917_v23, %v916_v35  ;;  %v2976_v9 = vmul.f32 %v2857_v29, %v2689_v34  ;;  %v2980_v62 = vmul.f32 %v2859_v10, %v2689_v34 }
 0x114   : > { %3924 = vst [vmem:[#allocation37_spill] sm:$0xff] %v2945_v56  ;;  %3925 = vst [vmem:[#allocation38_spill] sm:$0xff] %v2947_v19  ;;  %2223 = vset.pattern.permute.xlu1 %v3900_v14  ;;  %v2982_v8 = vrot.slane %v1191_v51, %v1190_v53  ;;  %v2986_v35 = vmul.f32 %v2857_v29, %v2696_v37  ;;  %v2990_v23 = vmul.f32 %v2859_v10, %v2696_v37 }
 0x115   : > { %871 = vperm.xlu1 %2223, %v2525_v21   ;;  %3930 = vst [vmem:[#allocation43_spill] sm:$0xff] %v2976_v9  ;;  %3931 = vst [vmem:[#allocation44_spill] sm:$0xff] %v2980_v62  ;;  %v2996_v12 = vrot.slane %v1195_v32, %v1190_v53  ;;  %v3000_v34 = vmul.f32 %v2859_v10, %v2698_v38  ;;  %v3004_v51 = vmul.f32 %v2857_v29, %v2702_v40 }
 0x116   : > { %v2955_v27 = vpop.permute.xlu0 %1185  ;;  %3932 = vst [vmem:[#allocation45_spill] sm:$0xff] %v2986_v35  ;;  %3933 = vst [vmem:[#allocation46_spill] sm:$0xff] %v2990_v23  ;;  %v527_v19 = vmul.f32 %v2859_v10, %v2736_v50  ;;  %v961_v37 = vmul.f32 %v2959_v57, %v844_v59  ;;  %v3012_v56 = vmul.f32 %v2859_v10, %v2702_v40 }
 0x117   : > { %v1118_v52 = vpop.permute.xlu1 %1117  ;;  %3926 = vst [vmem:[#allocation39_spill] sm:$0xff] %v2955_v27  ;;  %3934 = vst [vmem:[#allocation47_spill] sm:$0xff] %v3000_v34  ;;  %v524_v53 = vmul.f32 %v2857_v29, %v2728_v47  ;;  %v528_v38 = vmul.f32 %v2857_v29, %v2734_v49  ;;  %v529_v32 = vmul.f32 %v2859_v10, %v2734_v49 }
 0x118   : > { %v960_v40 = vmul.f32 %v2966_v25, %v844_v59  ;;  %v1235_v62 = vmul.f32 %v2996_v12, %v1118_v52  ;;  %v750_v50 = vadd.f32 %v2846_v15, %v526_v6  ;;  %v1236_v59 = vmul.f32 %v2982_v8, %v1122_v26 }
 0x119   : > { %867 = vperm.xlu1 %2223, %v2530_v22   ;;  %v752_v28 = vadd.f32 %v2844_v39, %v528_v38  ;;  %v753_v55 = vadd.f32 %v2844_v39, %v529_v32  ;;  %v1237_v35 = vmul.f32 %v2996_v12, %v1122_v26  ;;  %v749_v32 = vadd.f32 %v2834_v30, %v525_v36 }
 0x11a   : > { %v2968_v54 = vpop.permute.xlu0 %1173  ;;  %v1024_v47 = vadd.f32 %v960_v40, %v750_v50 }
 0x11b   : > { %v1114_v24 = vpop.permute.xlu1 %1113  ;;  %3928 = vst [vmem:[#allocation41_spill] sm:$0xff] %v2968_v54  ;;  %v751_v54 = vadd.f32 %v2846_v15, %v527_v19  ;;  %v1234_v19 = vmul.f32 %v2982_v8, %v1118_v52 }
 0x11d   : > { %2224 = vset.pattern.permute.xlu1 %v3901_v11  ;;  %v1025_v23 = vadd.f32 %v961_v37, %v751_v54  ;;  %v1298_v26 = vadd.f32 %v1234_v19, %v1024_v47  ;;  %v520_v19 = vmul.f32 %v2857_v29, %v2722_v46 }
 0x11e   : > { %1145 = vperm.xlu1 %2224, %v2525_v21  }
 0x11f   : > { %v3021_v13 = vpop.permute.xlu1 %1109  ;;  %v848_v27 = vpop.permute.xlu0 %847  ;;  %v1299_v15 = vadd.f32 %v1235_v62, %v1025_v23 }
 0x120   : > { %v962_v49 = vmul.f32 %v2966_v25, %v848_v27  ;;  %v963_v21 = vmul.f32 %v2959_v57, %v848_v27  ;;  %v748_v27 = vadd.f32 %v2834_v30, %v524_v53 }
 0x122   : > { %v1026_v9 = vadd.f32 %v962_v49, %v752_v28  ;;  %v1027_v38 = vadd.f32 %v963_v21, %v753_v55  ;;  %1141 = vperm.xlu1 %2224, %v2530_v22   ;;  %v522_v55 = vmul.f32 %v2857_v29, %v2730_v48  ;;  %v523_v22 = vmul.f32 %v2859_v10, %v2730_v48 }
 0x123   : > { %v3039_v39 = vpop.permute.xlu1 %1105  ;;  %v840_v34 = vpop.permute.xlu0 %839  ;;  %v1233_v28 = vmul.f32 %v2996_v12, %v1114_v24  ;;  %v1232_v48 = vmul.f32 %v2982_v8, %v1114_v24  ;;  %v1363_v21 = vmax.f32 %v1299_v15, 0.0 }
 0x124   : > { %v958_v6 = vmul.f32 %v2966_v25, %v840_v34  ;;  %v959_v54 = vmul.f32 %v2959_v57, %v840_v34  ;;  %v1301_v52 = vadd.f32 %v1237_v35, %v1027_v38  ;;  %v1300_v37 = vadd.f32 %v1236_v59, %v1026_v9 }
 0x125   : > { %v3055_v9 = vmul.f32 %v2857_v29, %v2704_v41  ;;  %v746_v35 = vadd.f32 %v2836_v2, %v522_v55  ;;  %v747_v34 = vadd.f32 %v2836_v2, %v523_v22  ;;  %v521_v59 = vmul.f32 %v2859_v10, %v2722_v46 }
 0x126   : > { %v1022_v53 = vadd.f32 %v958_v6, %v748_v27  ;;  %v1023_v30 = vadd.f32 %v959_v54, %v749_v32  ;;  %2226 = vset.pattern.permute.xlu1 %v3900_v14  ;;  %v1365_v62 = vmax.f32 %v1301_v52, 0.0  ;;  %v1364_v23 = vmax.f32 %v1300_v37, 0.0 }
 0x127   : > { %v3051_v36 = vpop.permute.xlu1 %1101  ;;  %859 = vperm.xlu1 %2226, %v2518_v20   ;;  %v836_v40 = vpop.permute.xlu0 %835  ;;  %v1362_v2 = vmax.f32 %v1298_v26, 0.0  ;;  %v1231_v38 = vmul.f32 %v2996_v12, %v3021_v13  ;;  %v744_v6 = vadd.f32 %v2822_v1, %v520_v19  ;;  %v745_v54 = vadd.f32 %v2822_v1, %v521_v59 }
 0x128   : > { %v956_v49 = vmul.f32 %v2966_v25, %v836_v40  ;;  %v957_v14 = vmul.f32 %v2959_v57, %v836_v40  ;;  %1654 = vmatprep.subr.mxu0 %v1365_v62  ;;  %2085 = vmatprep.subr.mxu1 %v1365_v62  ;;  %v1297_v50 = vadd.f32 %v1233_v28, %v1023_v30 }
 0x129   : > { %1655 = vmatpush1.msra.mxu0 %v1364_v23  ;;  %2117 = vmatpush1.msra.mxu1 %v1364_v23  ;;  %v1296_v24 = vadd.f32 %v1232_v48, %v1022_v53  ;;  %v1230_v46 = vmul.f32 %v2982_v8, %v3021_v13  ;;  %v518_v26 = vmul.f32 %v2857_v29, %v2724_v16 }
 0x12a   : > { %v1020_v27 = vadd.f32 %v956_v49, %v746_v35  ;;  %v1021_v32 = vadd.f32 %v957_v14, %v747_v34  ;;  %1656 = vmatprep.subr.mxu0 %v1363_v21  ;;  %2086 = vmatprep.subr.mxu1 %v1363_v21  ;;  %v1361_v15 = vmax.f32 %v1297_v50, 0.0  ;;  %v519_v1 = vmul.f32 %v2859_v10, %v2724_v16 }
 0x12b   : > { %v3069_v47 = vpop.permute.xlu1 %1097  ;;  %855 = vperm.xlu1 %2226, %v2501_v17   ;;  %v832_v52 = vpop.permute.xlu0 %831  ;;  %1657 = vmatpush1.msra.mxu0 %v1362_v2  ;;  %v1360_v37 = vmax.f32 %v1296_v24, 0.0  ;;  %v1229_v53 = vmul.f32 %v2996_v12, %v3039_v39  ;;  %v742_v34 = vadd.f32 %v2824_v63, %v518_v26  ;;  %v1228_v40 = vmul.f32 %v2982_v8, %v3039_v39 }
 0x12c   : > { %v954_v55 = vmul.f32 %v2966_v25, %v832_v52  ;;  %v955_v22 = vmul.f32 %v2959_v57, %v832_v52  ;;  %2118 = vmatpush1.msra.mxu1 %v1362_v2  ;;  %1658 = vmatprep.subr.mxu0 %v1361_v15  ;;  %v1295_v28 = vadd.f32 %v1231_v38, %v1021_v32 }
 0x12d   : > { %2087 = vmatprep.subr.mxu1 %v1361_v15  ;;  %1659 = vmatpush1.msra.mxu0 %v1360_v37  ;;  %v1294_v13 = vadd.f32 %v1230_v46, %v1020_v27  ;;  %v743_v48 = vadd.f32 %v2824_v63, %v519_v1  ;;  %v516_v19 = vmul.f32 %v2857_v29, %v2715_v44 }
 0x12e   : > { %v1018_v30 = vadd.f32 %v954_v55, %v744_v6  ;;  %v1019_v62 = vadd.f32 %v955_v22, %v745_v54  ;;  %2119 = vmatpush1.msra.mxu1 %v1360_v37  ;;  %v1359_v35 = vmax.f32 %v1295_v28, 0.0  ;;  %v517_v63 = vmul.f32 %v2859_v10, %v2715_v44 }
 0x12f   : > { %v3084_v23 = vpop.permute.xlu1 %1093  ;;  %2227 = vset.pattern.permute.xlu1 %v3901_v11  ;;  %v828_v16 = vpop.permute.xlu0 %827  ;;  %v1358_v49 = vmax.f32 %v1294_v13, 0.0  ;;  %v1227_v11 = vmul.f32 %v2996_v12, %v3051_v36  ;;  %v740_v38 = vadd.f32 %v2816_v4, %v516_v19  ;;  %v1226_v32 = vmul.f32 %v2982_v8, %v3051_v36 }
 0x130   : > { %v952_v14 = vmul.f32 %v2966_v25, %v828_v16  ;;  %v953_v21 = vmul.f32 %v2959_v57, %v828_v16  ;;  %1133 = vperm.xlu1 %2227, %v2518_v20   ;;  %1660 = vmatprep.subr.mxu0 %v1359_v35  ;;  %v1293_v50 = vadd.f32 %v1229_v53, %v1019_v62 }
 0x131   : > { %2088 = vmatprep.subr.mxu1 %v1359_v35  ;;  %1661 = vmatpush1.msra.mxu0 %v1358_v49  ;;  %v1292_v39 = vadd.f32 %v1228_v40, %v1018_v30  ;;  %v741_v27 = vadd.f32 %v2816_v4, %v517_v63  ;;  %v514_v52 = vmul.f32 %v2857_v29, %v2717_v45  ;;  %v1399_v63 = vld [vmem:[%s3856_s3 + $0x8] sm:$0xff] }
 0x132   : > { %v1016_v59 = vadd.f32 %v952_v14, %v742_v34  ;;  %v1017_v2 = vadd.f32 %v953_v21, %v743_v48  ;;  %2120 = vmatpush1.msra.mxu1 %v1358_v49  ;;  %v1357_v20 = vmax.f32 %v1293_v50, 0.0  ;;  %v515_v37 = vmul.f32 %v2859_v10, %v2717_v45  ;;  %1718 = vmatprep.mubr.f32.mxu0 %v1399_v63 }
 0x133   : > { %v3100_v24 = vpop.permute.xlu1 %1089  ;;  %v824_v44 = vpop.permute.xlu0 %823  ;;  %v1356_v15 = vmax.f32 %v1292_v39, 0.0  ;;  %v1225_v36 = vmul.f32 %v2996_v12, %v3069_v47  ;;  %v738_v26 = vadd.f32 %v2818_v61, %v514_v52  ;;  %v1224_v13 = vmul.f32 %v2982_v8, %v3069_v47  ;;  %v1431_v39 = vld [vmem:[%s3856_s3 + $0x108] sm:$0xff] }
 0x134   : > { %v950_v6 = vmul.f32 %v2966_v25, %v824_v44  ;;  %v951_v54 = vmul.f32 %v2959_v57, %v824_v44  ;;  %1129 = vperm.xlu1 %2227, %v2501_v17   ;;  %1662 = vmatprep.subr.mxu0 %v1357_v20  ;;  %v1291_v46 = vadd.f32 %v1227_v11, %v1017_v2 }
 0x135   : > { %2089 = vmatprep.subr.mxu1 %v1357_v20  ;;  %1663 = vmatpush1.msra.mxu0 %v1356_v15  ;;  %v1290_v4 = vadd.f32 %v1226_v32, %v1016_v59  ;;  %v739_v1 = vadd.f32 %v2818_v61, %v515_v37  ;;  %v512_v34 = vmul.f32 %v2857_v29, %v2709_v42 }
 0x136   : > { %v1014_v55 = vadd.f32 %v950_v6, %v740_v38  ;;  %v1015_v22 = vadd.f32 %v951_v54, %v741_v27  ;;  %2121 = vmatpush1.msra.mxu1 %v1356_v15  ;;  %v1355_v17 = vmax.f32 %v1291_v46, 0.0  ;;  %v513_v48 = vmul.f32 %v2859_v10, %v2709_v42  ;;  %1814 = vmatprep.mubr.f32.mxu1 %v1431_v39  ;;  %v1464_v39 = vld [vmem:[%s3857_s4 + $0x10] sm:$0xff] }
 0x137   : > { %v3115_v28 = vpop.permute.xlu1 %1085  ;;  %v820_v45 = vpop.permute.xlu0 %819  ;;  %v1354_v53 = vmax.f32 %v1290_v4, 0.0  ;;  %v1223_v47 = vmul.f32 %v2996_v12, %v3084_v23  ;;  %v736_v14 = vadd.f32 %v2808_v0, %v512_v34  ;;  %v1222_v50 = vmul.f32 %v2982_v8, %v3084_v23 }
 0x138   : > { %v948_v30 = vmul.f32 %v2966_v25, %v820_v45  ;;  %v949_v62 = vmul.f32 %v2959_v57, %v820_v45  ;;  %1125 = vperm.xlu1 %2227, %v2506_v18   ;;  %1664 = vmatprep.subr.mxu0 %v1355_v17  ;;  %v1289_v35 = vadd.f32 %v1225_v36, %v1015_v22 }
 0x139   : > { %2090 = vmatprep.subr.mxu1 %v1355_v17  ;;  %1665 = vmatpush1.msra.mxu0 %v1354_v53  ;;  %v1288_v61 = vadd.f32 %v1224_v13, %v1014_v55  ;;  %v737_v21 = vadd.f32 %v2808_v0, %v513_v48  ;;  %v510_v23 = vmul.f32 %v2857_v29, %v2711_v43  ;;  %v1463_v48 = vld [vmem:[%s3857_s4 + $0x8] sm:$0xff] }
 0x13a   : > { %v1012_v40 = vadd.f32 %v948_v30, %v738_v26  ;;  %v1013_v16 = vadd.f32 %v949_v62, %v739_v1  ;;  %2122 = vmatpush1.msra.mxu1 %v1354_v53  ;;  %v1353_v18 = vmax.f32 %v1289_v35, 0.0  ;;  %v511_v2 = vmul.f32 %v2859_v10, %v2711_v43 }
 0x13b   : > { %v3130_v49 = vpop.permute.xlu1 %1081  ;;  %v816_v42 = vpop.permute.xlu0 %815  ;;  %v1352_v19 = vmax.f32 %v1288_v61, 0.0  ;;  %v1221_v38 = vmul.f32 %v2996_v12, %v3100_v24  ;;  %v734_v6 = vadd.f32 %v2810_v31, %v510_v23  ;;  %v1220_v43 = vmul.f32 %v2982_v8, %v3100_v24 }
 0x13c   : > { %v946_v11 = vmul.f32 %v2966_v25, %v816_v42  ;;  %v947_v59 = vmul.f32 %v2959_v57, %v816_v42  ;;  %1666 = vmatprep.subr.mxu0 %v1353_v18  ;;  %2091 = vmatprep.subr.mxu1 %v1353_v18  ;;  %v1287_v0 = vadd.f32 %v1223_v47, %v1013_v16 }
 0x13d   : > { %1667 = vmatpush1.msra.mxu0 %v1352_v19  ;;  %2123 = vmatpush1.msra.mxu1 %v1352_v19  ;;  %v1286_v20 = vadd.f32 %v1222_v50, %v1012_v40  ;;  %v735_v54 = vadd.f32 %v2810_v31, %v511_v2  ;;  %v507_v55 = vmul.f32 %v2859_v10, %v2704_v41 }
 0x13e   : > { %v1010_v27 = vadd.f32 %v946_v11, %v736_v14  ;;  %v1011_v32 = vadd.f32 %v947_v59, %v737_v21  ;;  %v1351_v15 = vmax.f32 %v1287_v0, 0.0  ;;  %2230 = vset.pattern.permute.xlu1 %v3916_v5  ;;  %v3163_v31 = vmul.f32 %v2857_v29, %v2782_v7  ;;  %v3936_v11 = vld [vmem:[#allocation43_spill] sm:$0xff]  ;;  %v3937_v59 = vld [vmem:[#allocation13_spill] sm:$0xff] }
 0x13f   : > { %v3150_v44 = vpop.permute.xlu1 %1077  ;;  %v812_v46 = vpop.permute.xlu0 %811  ;;  %v1350_v52 = vmax.f32 %v1286_v20, 0.0  ;;  %v1219_v5 = vmul.f32 %v2996_v12, %v3115_v28  ;;  %v732_v13 = vadd.f32 %v2801_v3, %v3004_v51  ;;  %v733_v41 = vadd.f32 %v2801_v3, %v3012_v56  ;;  %v1462_v3 = vld [vmem:[%s3857_s4] sm:$0xff]  ;;  %1501 = vperm.xlu1 %2230, %v1463_v48  }
 0x140   : > { %v944_v37 = vmul.f32 %v2966_v25, %v812_v46  ;;  %v945_v4 = vmul.f32 %v2959_v57, %v812_v46  ;;  %1668 = vmatprep.subr.mxu0 %v1351_v15  ;;  %2092 = vmatprep.subr.mxu1 %v1351_v15  ;;  %v1285_v36 = vadd.f32 %v1221_v38, %v1011_v32  ;;  %v3938_v15 = vld [vmem:[#allocation45_spill] sm:$0xff] }
 0x141   : > { %1669 = vmatpush1.msra.mxu0 %v1350_v52  ;;  %2124 = vmatpush1.msra.mxu1 %v1350_v52  ;;  %v1284_v24 = vadd.f32 %v1220_v43, %v1010_v27  ;;  %v1218_v45 = vmul.f32 %v2982_v8, %v3115_v28  ;;  %v561_v56 = vmul.f32 %v2859_v10, %v2782_v7 }
 0x142   : > { %v1008_v22 = vadd.f32 %v944_v37, %v734_v6  ;;  %v1009_v17 = vadd.f32 %v945_v4, %v735_v54  ;;  %v1349_v1 = vmax.f32 %v1285_v36, 0.0  ;;  %v3187_v51 = vadd.f32 %v2788_v58, %v2994_v33  ;;  %1496 = vperm.xlu0 %2229, %v1462_v3   ;;  %v3940_v54 = vld [vmem:[#allocation46_spill] sm:$0xff] }
 0x143   : > { %v3167_v26 = vpop.permute.xlu1 %1073  ;;  %v808_v53 = vpop.permute.xlu0 %807  ;;  %v1348_v30 = vmax.f32 %v1284_v24, 0.0  ;;  %v1217_v61 = vmul.f32 %v2996_v12, %v3130_v49  ;;  %v730_v7 = vadd.f32 %v2803_v60, %v3055_v9  ;;  %v731_v14 = vadd.f32 %v2803_v60, %v507_v55  ;;  %v1465_v60 = vld [vmem:[%s3857_s4 + $0x18] sm:$0xff]  ;;  %v3935_v9 = vld [vmem:[#allocation47_spill] sm:$0xff]  ;;  %1506 = vperm.xlu1 %2230, %v1464_v39   ;;  %v1466_v24 = vld [vmem:[%s3857_s4 + $0x20] sm:$0xff] }
 0x144   : > { %v942_v62 = vmul.f32 %v2966_v25, %v808_v53  ;;  %v943_v35 = vmul.f32 %v2959_v57, %v808_v53  ;;  %1670 = vmatprep.subr.mxu0 %v1349_v1  ;;  %2093 = vmatprep.subr.mxu1 %v1349_v1  ;;  %v1283_v34 = vadd.f32 %v1219_v5, %v1009_v17  ;;  %v1467_v5 = vld [vmem:[%s3857_s4 + $0x28] sm:$0xff]  ;;  %v3942_v17 = vld [vmem:[#allocation15_spill] sm:$0xff] }
 0x145   : > { %1671 = vmatpush1.msra.mxu0 %v1348_v30  ;;  %2125 = vmatpush1.msra.mxu1 %v1348_v30  ;;  %v1282_v28 = vadd.f32 %v1218_v45, %v1008_v22  ;;  %v1216_v33 = vmul.f32 %v2982_v8, %v3130_v49  ;;  %v3208_v49 = vadd.f32 %v2788_v58, %v3935_v9  ;;  %v3939_v58 = vld [vmem:[#allocation14_spill] sm:$0xff]  ;;  %v3941_v22 = vld [vmem:[#allocation40_spill] sm:$0xff]  ;;  %v3945_v39 = vld [vmem:[#allocation39_spill] sm:$0xff] }
 0x146   : > { %v1006_v47 = vadd.f32 %v942_v62, %v732_v13  ;;  %v1007_v40 = vadd.f32 %v943_v35, %v733_v41  ;;  %v1347_v18 = vmax.f32 %v1283_v34, 0.0  ;;  %v3212_v0 = vadd.f32 %v3937_v59, %v3936_v11  ;;  %1511 = vperm.xlu0 %2229, %v1465_v60   ;;  %v3943_v1 = vld [vmem:[#allocation42_spill] sm:$0xff]  ;;  %v3944_v45 = vld [vmem:[#allocation36_spill] sm:$0xff] }
 0x147   : > { %v3191_v16 = vpop.permute.xlu1 %1069  ;;  %v804_v21 = vpop.permute.xlu0 %803  ;;  %v1346_v50 = vmax.f32 %v1282_v28, 0.0  ;;  %v1215_v2 = vmul.f32 %v2996_v12, %v3150_v44  ;;  %v728_v6 = vadd.f32 %v3939_v58, %v3938_v15  ;;  %v729_v43 = vadd.f32 %v3939_v58, %v3940_v54  ;;  %1516 = vperm.xlu1 %2230, %v1466_v24   ;;  %v1470_v58 = vld [vmem:[%s3857_s4 + $0x40] sm:$0xff] }
 0x148   : > { %v940_v42 = vmul.f32 %v2966_v25, %v804_v21  ;;  %v941_v19 = vmul.f32 %v2959_v57, %v804_v21  ;;  %1672 = vmatprep.subr.mxu0 %v1347_v18  ;;  %2094 = vmatprep.subr.mxu1 %v1347_v18  ;;  %v1281_v63 = vadd.f32 %v1217_v61, %v1007_v40 }
 0x149   : > { %1673 = vmatpush1.msra.mxu0 %v1346_v50  ;;  %2126 = vmatpush1.msra.mxu1 %v1346_v50  ;;  %v1280_v23 = vadd.f32 %v1216_v33, %v1006_v47  ;;  %v1214_v46 = vmul.f32 %v2982_v8, %v3150_v44  ;;  %v726_v44 = vadd.f32 %v3942_v17, %v3941_v22 }
 0x14a   : > { %v1004_v20 = vadd.f32 %v940_v42, %v730_v7  ;;  %v1005_v38 = vadd.f32 %v941_v19, %v731_v14  ;;  %v1345_v32 = vmax.f32 %v1281_v63, 0.0  ;;  %v727_v13 = vadd.f32 %v3942_v17, %v3943_v1  ;;  %1521 = vperm.xlu0 %2229, %v1467_v5   ;;  %v1472_v1 = vld [vmem:[%s3857_s4 + $0x50] sm:$0xff] }
 0x14b   : > { %v3216_v27 = vpop.permute.xlu1 %1065  ;;  %v800_v52 = vpop.permute.xlu0 %799  ;;  %v1344_v37 = vmax.f32 %v1280_v23, 0.0  ;;  %v784_v53 = vadd.f32 %v3944_v45, %v3163_v31  ;;  %v785_v34 = vadd.f32 %v3944_v45, %v561_v56  ;;  %v1212_v48 = vmul.f32 %v2982_v8, %v3167_v26  ;;  %v1468_v56 = vld [vmem:[%s3857_s4 + $0x30] sm:$0xff] }
 0x14c   : > { %v938_v4 = vmul.f32 %v2966_v25, %v800_v52  ;;  %v939_v36 = vmul.f32 %v2959_v57, %v800_v52  ;;  %1674 = vmatprep.subr.mxu0 %v1345_v32  ;;  %2095 = vmatprep.subr.mxu1 %v1345_v32  ;;  %v1279_v55 = vadd.f32 %v1215_v2, %v1005_v38 }
 0x14d   : > { %1675 = vmatpush1.msra.mxu0 %v1344_v37  ;;  %2127 = vmatpush1.msra.mxu1 %v1344_v37  ;;  %v1278_v41 = vadd.f32 %v1214_v46, %v1004_v20  ;;  %v1213_v3 = vmul.f32 %v2996_v12, %v3167_v26  ;;  %v1469_v26 = vld [vmem:[%s3857_s4 + $0x38] sm:$0xff]  ;;  %v1210_v14 = vmul.f32 %v2982_v8, %v3191_v16 }
 0x14e   : > { %v1002_v30 = vadd.f32 %v938_v4, %v728_v6  ;;  %v1003_v62 = vadd.f32 %v939_v36, %v729_v43  ;;  %v1343_v35 = vmax.f32 %v1279_v55, 0.0  ;;  %v1211_v50 = vmul.f32 %v2996_v12, %v3191_v16  ;;  %1526 = vperm.xlu1 %2230, %v1468_v56   ;;  %1531 = vperm.xlu0 %2229, %v1469_v26   ;;  %v1471_v6 = vld [vmem:[%s3857_s4 + $0x48] sm:$0xff]  ;;  %v3946_v55 = vld [vmem:[#allocation44_spill] sm:$0xff] }
 0x14f   : > { %v796_v28 = vpop.permute.xlu0 %795  ;;  %v1342_v47 = vmax.f32 %v1278_v41, 0.0  ;;  %v1269_v60 = vmul.f32 %v2996_v12, %v3945_v39  ;;  %v1268_v54 = vmul.f32 %v2982_v8, %v3945_v39  ;;  %v1209_v43 = vmul.f32 %v2996_v12, %v3216_v27  ;;  %v3948_v56 = vld [vmem:[#allocation34_spill] sm:$0xff]  ;;  %v3950_v39 = vld [vmem:[#allocation12_spill] sm:$0xff] }
 0x150   : > { %v912_v61 = vpop.permute.xlu1 %911  ;;  %v936_v40 = vmul.f32 %v2966_v25, %v796_v28  ;;  %v937_v31 = vmul.f32 %v2959_v57, %v796_v28  ;;  %1676 = vmatprep.subr.mxu0 %v1343_v35  ;;  %2096 = vmatprep.subr.mxu1 %v1343_v35  ;;  %v1277_v33 = vadd.f32 %v1213_v3, %v1003_v62  ;;  %v1474_v28 = vld [vmem:[%s3857_s4 + $0x60] sm:$0xff] }
 0x151   : > { %v994_v18 = vmul.f32 %v2966_v25, %v912_v61  ;;  %v995_v7 = vmul.f32 %v2959_v57, %v912_v61  ;;  %1677 = vmatpush1.msra.mxu0 %v1342_v47  ;;  %v1276_v21 = vadd.f32 %v1212_v48, %v1002_v30  ;;  %2128 = vmatpush1.msra.mxu1 %v1342_v47  ;;  %v3947_v61 = vld [vmem:[#allocation41_spill] sm:$0xff] }
 0x152   : > { %v1000_v42 = vadd.f32 %v936_v40, %v726_v44  ;;  %v1001_v19 = vadd.f32 %v937_v31, %v727_v13  ;;  %v1341_v23 = vmax.f32 %v1277_v33, 0.0  ;;  %v723_v24 = vadd.f32 %v3937_v59, %v3946_v55  ;;  %1536 = vperm.xlu1 %2230, %v1470_v58   ;;  %1541 = vperm.xlu0 %2229, %v1471_v6   ;;  %v1473_v59 = vld [vmem:[%s3857_s4 + $0x58] sm:$0xff]  ;;  %v1476_v58 = vld [vmem:[%s3857_s4 + $0x70] sm:$0xff] }
 0x153   : > { %v1059_v63 = vadd.f32 %v995_v7, %v785_v34  ;;  %v1058_v9 = vadd.f32 %v994_v18, %v784_v53  ;;  %v792_v11 = vpop.permute.xlu0 %791  ;;  %v1340_v2 = vmax.f32 %v1276_v21, 0.0  ;;  %v1208_v5 = vmul.f32 %v2982_v8, %v3216_v27  ;;  %v1477_v6 = vld [vmem:[%s3857_s4 + $0x78] sm:$0xff] }
 0x154   : > { %v934_v20 = vmul.f32 %v2966_v25, %v792_v11  ;;  %v935_v38 = vmul.f32 %v2959_v57, %v792_v11  ;;  %v1275_v15 = vadd.f32 %v1211_v50, %v1001_v19  ;;  %v1274_v16 = vadd.f32 %v1210_v14, %v1000_v42  ;;  %1678 = vmatprep.subr.mxu0 %v1341_v23  ;;  %v3949_v14 = vld [vmem:[#allocation35_spill] sm:$0xff] }
 0x155   : > { %v1062_v32 = vpop.permute.xlu1 %1061  ;;  %2097 = vmatprep.subr.mxu1 %v1341_v23  ;;  %v3271_v46 = vadd.f32 %v1269_v60, %v1059_v63  ;;  %1679 = vmatpush1.msra.mxu0 %v1340_v2  ;;  %v3279_v17 = vadd.f32 %v1268_v54, %v1058_v9  ;;  %v1263_v47 = vmul.f32 %v2996_v12, %v3947_v61  ;;  %v3952_v54 = vld [vmem:[#allocation38_spill] sm:$0xff] }
 0x156   : > { %v998_v52 = vadd.f32 %v934_v20, %v3187_v51  ;;  %v999_v37 = vadd.f32 %v935_v38, %v3208_v49  ;;  %2129 = vmatpush1.msra.mxu1 %v1340_v2  ;;  %v1339_v4 = vmax.f32 %v1275_v15, 0.0  ;;  %v1338_v36 = vmax.f32 %v1274_v16, 0.0  ;;  %1546 = vperm.xlu1 %2230, %v1472_v1   ;;  %v3951_v2 = vld [vmem:[#allocation37_spill] sm:$0xff] }
 0x157   : > { %v788_v22 = vpop.permute.xlu0 %787  ;;  %v1206_v53 = vmul.f32 %v2982_v8, %v1062_v32  ;;  %v1207_v30 = vmul.f32 %v2996_v12, %v1062_v32  ;;  %1551 = vperm.xlu0 %2229, %v1473_v59   ;;  %v1262_v21 = vmul.f32 %v2982_v8, %v3947_v61  ;;  %v556_v60 = vmul.f32 %v2857_v29, %v3950_v39 }
 0x158   : > { %v932_v44 = vmul.f32 %v2966_v25, %v788_v22  ;;  %v933_v51 = vmul.f32 %v2959_v57, %v788_v22  ;;  %1680 = vmatprep.subr.mxu0 %v1339_v4  ;;  %2098 = vmatprep.subr.mxu1 %v1339_v4  ;;  %v1273_v49 = vadd.f32 %v1209_v43, %v999_v37  ;;  %v1397_v11 = vmax.f32 %v3271_v46, 0.0  ;;  %v3953_v4 = vld [vmem:[#allocation33_spill] sm:$0xff] }
 0x159   : > { %1681 = vmatpush1.msra.mxu0 %v1338_v36  ;;  %2130 = vmatpush1.msra.mxu1 %v1338_v36  ;;  %v1272_v13 = vadd.f32 %v1208_v5, %v998_v52  ;;  %v557_v9 = vmul.f32 %v2859_v10, %v3950_v39  ;;  %v1396_v16 = vmax.f32 %v3279_v17, 0.0  ;;  %v780_v36 = vadd.f32 %v3953_v4, %v556_v60 }
 0x15a   : > { %v908_v27 = vpop.permute.xlu1 %907  ;;  %v996_v41 = vadd.f32 %v932_v44, %v3212_v0  ;;  %v997_v45 = vadd.f32 %v933_v51, %v723_v24  ;;  %v1337_v35 = vmax.f32 %v1273_v49, 0.0  ;;  %v1475_v0 = vld [vmem:[%s3857_s4 + $0x68] sm:$0xff]  ;;  %1556 = vperm.xlu1 %2230, %v1474_v28   ;;  %v1481_v28 = vld [vmem:[%s3857_s4 + $0x98] sm:$0xff] }
 0x15b   : > { %v900_v62 = vpop.permute.xlu0 %899  ;;  %v1336_v34 = vmax.f32 %v1272_v13, 0.0  ;;  %v992_v7 = vmul.f32 %v2966_v25, %v908_v27  ;;  %v993_v50 = vmul.f32 %v2959_v57, %v908_v27  ;;  %1561 = vperm.xlu0 %2229, %v1475_v0   ;;  %v781_v55 = vadd.f32 %v3953_v4, %v557_v9  ;;  %v1478_v27 = vld [vmem:[%s3857_s4 + $0x80] sm:$0xff]  ;;  %v1479_v13 = vld [vmem:[%s3857_s4 + $0x88] sm:$0xff] }
 0x15c   : > { %v988_v48 = vmul.f32 %v2966_v25, %v900_v62  ;;  %v989_v3 = vmul.f32 %v2959_v57, %v900_v62  ;;  %1682 = vmatprep.subr.mxu0 %v1337_v35  ;;  %2099 = vmatprep.subr.mxu1 %v1337_v35  ;;  %v1271_v31 = vadd.f32 %v1207_v30, %v997_v45 }
 0x15d   : > { %v1270_v18 = vadd.f32 %v1206_v53, %v996_v41  ;;  %1683 = vmatpush1.msra.mxu0 %v1336_v34  ;;  %2131 = vmatpush1.msra.mxu1 %v1336_v34  ;;  %v1056_v20 = vadd.f32 %v992_v7, %v3951_v2  ;;  %v1057_v43 = vadd.f32 %v993_v50, %v3952_v54  ;;  %v3956_v50 = vld [vmem:[#allocation10_spill] sm:$0xff] }
 0x15e   : > { %v904_v40 = vpop.permute.xlu1 %903  ;;  %v1052_v26 = vadd.f32 %v988_v48, %v3948_v56  ;;  %v1053_v33 = vadd.f32 %v989_v3, %v3949_v14  ;;  %v1335_v42 = vmax.f32 %v1271_v31, 0.0  ;;  %1566 = vperm.xlu1 %2230, %v1476_v58   ;;  %v1480_v3 = vld [vmem:[%s3857_s4 + $0x90] sm:$0xff]  ;;  %v1482_v56 = vld [vmem:[%s3857_s4 + $0xa0] sm:$0xff]  ;;  %v3955_v14 = vld [vmem:[#allocation30_spill] sm:$0xff] }
 0x15f   : > { %v1334_v19 = vmax.f32 %v1270_v18, 0.0  ;;  %v990_v38 = vmul.f32 %v2966_v25, %v904_v40  ;;  %v991_v32 = vmul.f32 %v2959_v57, %v904_v40  ;;  %v3324_v46 = vpop.permute.xlu0 %887  ;;  %1571 = vperm.xlu0 %2229, %v1477_v6  }
 0x160   : > { %v1327_v63 = vadd.f32 %v1263_v47, %v1053_v33  ;;  %1684 = vmatprep.subr.mxu0 %v1335_v42  ;;  %2100 = vmatprep.subr.mxu1 %v1335_v42  ;;  %v1326_v23 = vadd.f32 %v1262_v21, %v1052_v26  ;;  %v3954_v47 = vld [vmem:[#allocation11_spill] sm:$0xff]  ;;  %v1483_v26 = vld [vmem:[%s3857_s4 + $0xa8] sm:$0xff]  ;;  %v549_v42 = vmul.f32 %v2859_v10, %v3956_v50 }
 0x161   : > { %1685 = vmatpush1.msra.mxu0 %v1334_v19  ;;  %2132 = vmatpush1.msra.mxu1 %v1334_v19  ;;  %v1054_v22 = vadd.f32 %v990_v38, %v780_v36  ;;  %v1055_v17 = vadd.f32 %v991_v32, %v781_v55  ;;  %v552_v40 = vmul.f32 %v2857_v29, %v3954_v47  ;;  %v1484_v38 = vld [vmem:[%s3857_s4 + $0xb0] sm:$0xff]  ;;  %v1485_v32 = vld [vmem:[%s3857_s4 + $0xb8] sm:$0xff] }
 0x162   : > { %1686 = vmatprep.subr.mxu0 %v1397_v11  ;;  %2101 = vmatprep.subr.mxu1 %v1397_v11  ;;  %v1391_v34 = vmax.f32 %v1327_v63, 0.0  ;;  %v1390_v48 = vmax.f32 %v1326_v23, 0.0  ;;  %v553_v31 = vmul.f32 %v2859_v10, %v3954_v47  ;;  %v983_v19 = vmul.f32 %v2959_v57, %v3324_v46 }
 0x163   : > { %v1182_v15 = vpop.permute.xlu1 %1181  ;;  %1687 = vmatpush2.msra.mxu0 %v1396_v16  ;;  %2133 = vmatpush2.msra.mxu1 %v1396_v16  ;;  %v3338_v41 = vpop.permute.xlu0 %875  ;;  %v776_v33 = vadd.f32 %v3955_v14, %v552_v40  ;;  %v3957_v16 = vld [vmem:[#allocation27_spill] sm:$0xff]  ;;  %v982_v6 = vmul.f32 %v2966_v25, %v3324_v46 }
 0x164   : > { %v1266_v52 = vmul.f32 %v2982_v8, %v1182_v15  ;;  %v1267_v37 = vmul.f32 %v2996_v12, %v1182_v15  ;;  %1576 = vperm.xlu1 %2230, %v1478_v27   ;;  %1581 = vperm.xlu0 %2229, %v1479_v13   ;;  %v777_v21 = vadd.f32 %v3955_v14, %v553_v31 }
 0x165   : > { %v548_v15 = vmul.f32 %v2857_v29, %v3956_v50  ;;  %v773_v58 = vadd.f32 %v3957_v16, %v549_v42  ;;  %v3961_v50 = vld [vmem:[#allocation28_spill] sm:$0xff] }
 0x166   : > { %v1330_v24 = vadd.f32 %v1266_v52, %v1056_v20  ;;  %v1331_v5 = vadd.f32 %v1267_v37, %v1057_v43 }
 0x167   : > { %v1178_v44 = vpop.permute.xlu1 %1177  ;;  %v3346_v0 = vpop.permute.xlu0 %863  ;;  %v772_v37 = vadd.f32 %v3957_v16, %v548_v15  ;;  %v1047_v4 = vadd.f32 %v983_v19, %v773_v58  ;;  %v1492_v15 = vld [vmem:[%s3857_s4 + $0xf0] sm:$0xff]  ;;  %v1493_v16 = vld [vmem:[%s3857_s4 + $0xf8] sm:$0xff] }
 0x168   : > { %v1264_v51 = vmul.f32 %v2982_v8, %v1178_v44  ;;  %v1265_v49 = vmul.f32 %v2996_v12, %v1178_v44  ;;  %v1395_v1 = vmax.f32 %v1331_v5, 0.0  ;;  %v1394_v59 = vmax.f32 %v1330_v24, 0.0  ;;  %1586 = vperm.xlu1 %2230, %v1480_v3   ;;  %1591 = vperm.xlu0 %2229, %v1481_v28   ;;  %v3958_v24 = vld [vmem:[#allocation31_spill] sm:$0xff] }
 0x169   : > { %v1488_v28 = vld [vmem:[%s3857_s4 + $0xd0] sm:$0xff] }
 0x16a   : > { %v1328_v45 = vadd.f32 %v1264_v51, %v1054_v22  ;;  %v1329_v53 = vadd.f32 %v1265_v49, %v1055_v17  ;;  %1688 = vmatprep.subr.mxu0 %v1395_v1  ;;  %2102 = vmatprep.subr.mxu1 %v1395_v1  ;;  %v3959_v22 = vld [vmem:[#allocation32_spill] sm:$0xff]  ;;  %v1046_v51 = vadd.f32 %v982_v6, %v772_v37 }
 0x16b   : > { %1689 = vmatpush2.msra.mxu0 %v1394_v59  ;;  %2134 = vmatpush2.msra.mxu1 %v1394_v59 }
 0x16c   : > { %v896_v30 = vpop.permute.xlu1 %895  ;;  %v1393_v62 = vmax.f32 %v1329_v53, 0.0  ;;  %v1392_v35 = vmax.f32 %v1328_v45, 0.0  ;;  %v1162_v60 = vpop.permute.xlu0 %1161  ;;  %1596 = vperm.xlu1 %2230, %v1482_v56   ;;  %1601 = vperm.xlu0 %2229, %v1483_v26   ;;  %v1486_v45 = vld [vmem:[%s3857_s4 + $0xc0] sm:$0xff]  ;;  %v1487_v53 = vld [vmem:[%s3857_s4 + $0xc8] sm:$0xff] }
 0x16d   : > { %v986_v18 = vmul.f32 %v2966_v25, %v896_v30  ;;  %v987_v7 = vmul.f32 %v2959_v57, %v896_v30  ;;  %v1257_v54 = vmul.f32 %v2996_v12, %v1162_v60  ;;  %v1256_v36 = vmul.f32 %v2982_v8, %v1162_v60  ;;  %v3960_v56 = vld [vmem:[#allocation9_spill] sm:$0xff] }
 0x16e   : > { %1690 = vmatprep.subr.mxu0 %v1393_v62  ;;  %2103 = vmatprep.subr.mxu1 %v1393_v62  ;;  %v544_v26 = vmul.f32 %v2857_v29, %v3960_v56  ;;  %v545_v14 = vmul.f32 %v2859_v10, %v3960_v56  ;;  %v3962_v60 = vld [vmem:[#allocation29_spill] sm:$0xff] }
 0x16f   : > { %1691 = vmatpush2.msra.mxu0 %v1392_v35  ;;  %2135 = vmatpush2.msra.mxu1 %v1392_v35  ;;  %v1050_v63 = vadd.f32 %v986_v18, %v776_v33  ;;  %v1051_v39 = vadd.f32 %v987_v7, %v777_v21  ;;  %v1321_v59 = vadd.f32 %v1257_v54, %v1047_v4  ;;  %v1490_v18 = vld [vmem:[%s3857_s4 + $0xe0] sm:$0xff]  ;;  %v1491_v7 = vld [vmem:[%s3857_s4 + $0xe8] sm:$0xff] }
 0x170   : > { %v892_v61 = vpop.permute.xlu1 %891  ;;  %1692 = vmatprep.subr.mxu0 %v1391_v34  ;;  %2104 = vmatprep.subr.mxu1 %v1391_v34  ;;  %v1320_v30 = vadd.f32 %v1256_v36, %v1046_v51  ;;  %v977_v33 = vmul.f32 %v2959_v57, %v3338_v41  ;;  %v1150_v21 = vpop.permute.xlu0 %1149 }
 0x171   : > { %1693 = vmatpush2.msra.mxu0 %v1390_v48  ;;  %2136 = vmatpush2.msra.mxu1 %v1390_v48  ;;  %v984_v11 = vmul.f32 %v2966_v25, %v892_v61  ;;  %v985_v23 = vmul.f32 %v2959_v57, %v892_v61  ;;  %v1385_v48 = vmax.f32 %v1321_v59, 0.0  ;;  %v1489_v61 = vld [vmem:[%s3857_s4 + $0xd8] sm:$0xff]  ;;  %v1251_v58 = vmul.f32 %v2996_v12, %v1150_v21 }
 0x172   : > { %1606 = vperm.xlu1 %2230, %v1484_v38   ;;  %1611 = vperm.xlu0 %2229, %v1485_v32   ;;  %v1384_v3 = vmax.f32 %v1320_v30, 0.0  ;;  %v976_v32 = vmul.f32 %v2966_v25, %v3338_v41  ;;  %v1250_v37 = vmul.f32 %v2982_v8, %v1150_v21 }
 0x173   : > { %v1048_v5 = vadd.f32 %v984_v11, %v3958_v24  ;;  %v1049_v17 = vadd.f32 %v985_v23, %v3959_v22 }
 0x174   : > { %v1138_v56 = vpop.permute.xlu0 %1137 }
 0x175   : > { %v1170_v9 = vpop.permute.xlu1 %1169 }
 0x176   : > { %v1260_v2 = vmul.f32 %v2982_v8, %v1170_v9  ;;  %v1261_v20 = vmul.f32 %v2996_v12, %v1170_v9  ;;  %1616 = vperm.xlu1 %2230, %v1486_v45   ;;  %1621 = vperm.xlu0 %2229, %v1487_v53  }
 0x178   : > { %v1324_v43 = vadd.f32 %v1260_v2, %v1050_v63  ;;  %v1325_v52 = vadd.f32 %v1261_v20, %v1051_v39  ;;  %v3963_v2 = vld [vmem:[#allocation24_spill] sm:$0xff] }
 0x179   : > { %v1166_v55 = vpop.permute.xlu1 %1165  ;;  %v768_v20 = vadd.f32 %v3963_v2, %v544_v26  ;;  %v769_v38 = vadd.f32 %v3963_v2, %v545_v14 }
 0x17a   : > { %v1258_v44 = vmul.f32 %v2982_v8, %v1166_v55  ;;  %v1259_v46 = vmul.f32 %v2996_v12, %v1166_v55  ;;  %v1389_v49 = vmax.f32 %v1325_v52, 0.0  ;;  %v1388_v1 = vmax.f32 %v1324_v43, 0.0  ;;  %1626 = vperm.xlu1 %2230, %v1488_v28   ;;  %1631 = vperm.xlu0 %2229, %v1489_v61   ;;  %v3964_v43 = vld [vmem:[#allocation26_spill] sm:$0xff]  ;;  %v3967_v28 = vld [vmem:[#allocation7_spill] sm:$0xff] }
 0x17b   : > { %v1041_v52 = vadd.f32 %v977_v33, %v3964_v43  ;;  %v536_v61 = vmul.f32 %v2857_v29, %v3967_v28 }
 0x17c   : > { %v1322_v27 = vadd.f32 %v1258_v44, %v1048_v5  ;;  %v1323_v13 = vadd.f32 %v1259_v46, %v1049_v17  ;;  %1694 = vmatprep.subr.mxu0 %v1389_v49  ;;  %2105 = vmatprep.subr.mxu1 %v1389_v49  ;;  %v3965_v17 = vld [vmem:[#allocation25_spill] sm:$0xff] }
 0x17d   : > { %1695 = vmatpush2.msra.mxu0 %v1388_v1  ;;  %2137 = vmatpush2.msra.mxu1 %v1388_v1  ;;  %v1040_v44 = vadd.f32 %v976_v32, %v3965_v17  ;;  %v1315_v46 = vadd.f32 %v1251_v58, %v1041_v52  ;;  %v3970_v32 = vld [vmem:[#allocation22_spill] sm:$0xff] }
 0x17e   : > { %v884_v62 = vpop.permute.xlu1 %883  ;;  %v1387_v35 = vmax.f32 %v1323_v13, 0.0  ;;  %v1386_v34 = vmax.f32 %v1322_v27, 0.0  ;;  %1636 = vperm.xlu1 %2230, %v1490_v18   ;;  %1641 = vperm.xlu0 %2229, %v1491_v7   ;;  %v537_v18 = vmul.f32 %v2859_v10, %v3967_v28  ;;  %v971_v7 = vmul.f32 %v2959_v57, %v3346_v0 }
 0x17f   : > { %v980_v40 = vmul.f32 %v2966_v25, %v884_v62  ;;  %v981_v31 = vmul.f32 %v2959_v57, %v884_v62  ;;  %v1314_v1 = vadd.f32 %v1250_v37, %v1040_v44  ;;  %v1379_v45 = vmax.f32 %v1315_v46, 0.0  ;;  %v3966_v62 = vld [vmem:[#allocation8_spill] sm:$0xff] }
 0x180   : > { %1696 = vmatprep.subr.mxu0 %v1387_v35  ;;  %2106 = vmatprep.subr.mxu1 %v1387_v35  ;;  %v540_v35 = vmul.f32 %v2857_v29, %v3966_v62 }
 0x181   : > { %1697 = vmatpush2.msra.mxu0 %v1386_v34  ;;  %2138 = vmatpush2.msra.mxu1 %v1386_v34  ;;  %v1044_v42 = vadd.f32 %v980_v40, %v3961_v50  ;;  %v1045_v9 = vadd.f32 %v981_v31, %v3962_v60  ;;  %v1378_v53 = vmax.f32 %v1314_v1, 0.0  ;;  %v541_v34 = vmul.f32 %v2859_v10, %v3966_v62  ;;  %v3972_v1 = vld [vmem:[#allocation5_spill] sm:$0xff]  ;;  %v3973_v62 = vld [vmem:[#allocation19_spill] sm:$0xff] }
 0x182   : > { %v880_v47 = vpop.permute.xlu1 %879  ;;  %1698 = vmatprep.subr.mxu0 %v1385_v48  ;;  %2107 = vmatprep.subr.mxu1 %v1385_v48  ;;  %v970_v60 = vmul.f32 %v2966_v25, %v3346_v0 }
 0x183   : > { %1699 = vmatpush2.msra.mxu0 %v1384_v3  ;;  %2139 = vmatpush2.msra.mxu1 %v1384_v3  ;;  %v978_v19 = vmul.f32 %v2966_v25, %v880_v47  ;;  %v979_v63 = vmul.f32 %v2959_v57, %v880_v47  ;;  %v3968_v47 = vld [vmem:[#allocation21_spill] sm:$0xff] }
 0x184   : > { %1646 = vperm.xlu1 %2230, %v1492_v15   ;;  %1651 = vperm.xlu0 %2229, %v1493_v16   ;;  %v764_v40 = vadd.f32 %v3968_v47, %v540_v35  ;;  %v765_v31 = vadd.f32 %v3968_v47, %v541_v34  ;;  %v3971_v16 = vld [vmem:[#allocation23_spill] sm:$0xff]  ;;  %v3974_v34 = vld [vmem:[#allocation20_spill] sm:$0xff] }
 0x185   : > { %v1042_v4 = vadd.f32 %v978_v19, %v768_v20  ;;  %v1043_v36 = vadd.f32 %v979_v63, %v769_v38  ;;  %v3969_v63 = vld [vmem:[#allocation18_spill] sm:$0xff]  ;;  %v1244_v38 = vmul.f32 %v2982_v8, %v1138_v56 }
 0x187   : > { %v1158_v39 = vpop.permute.xlu1 %1157 }
 0x188   : > { %v1254_v11 = vmul.f32 %v2982_v8, %v1158_v39  ;;  %v1255_v23 = vmul.f32 %v2996_v12, %v1158_v39  ;;  %v761_v39 = vadd.f32 %v3969_v63, %v537_v18 }
 0x18a   : > { %v1318_v6 = vadd.f32 %v1254_v11, %v1044_v42  ;;  %v1319_v54 = vadd.f32 %v1255_v23, %v1045_v9  ;;  %v760_v9 = vadd.f32 %v3969_v63, %v536_v61  ;;  %v1245_v11 = vmul.f32 %v2996_v12, %v1138_v56  ;;  %v3975_v61 = vld [vmem:[#allocation16_spill] sm:$0xff] }
 0x18b   : > { %v1154_v55 = vpop.permute.xlu1 %1153  ;;  %v1035_v20 = vadd.f32 %v971_v7, %v761_v39 }
 0x18c   : > { %v1252_v41 = vmul.f32 %v2982_v8, %v1154_v55  ;;  %v1253_v24 = vmul.f32 %v2996_v12, %v1154_v55  ;;  %v1383_v5 = vmax.f32 %v1319_v54, 0.0  ;;  %v1382_v22 = vmax.f32 %v1318_v6, 0.0 }
 0x18d   : > { %v1034_v37 = vadd.f32 %v970_v60, %v760_v9  ;;  %v3977_v9 = vld [vmem:[#allocation17_spill] sm:$0xff] }
 0x18e   : > { %v1316_v51 = vadd.f32 %v1252_v41, %v1042_v4  ;;  %v1317_v49 = vadd.f32 %v1253_v24, %v1043_v36  ;;  %1700 = vmatprep.subr.mxu0 %v1383_v5  ;;  %2108 = vmatprep.subr.mxu1 %v1383_v5  ;;  %v1309_v4 = vadd.f32 %v1245_v11, %v1035_v20 }
 0x18f   : > { %1701 = vmatpush2.msra.mxu0 %v1382_v22  ;;  %2140 = vmatpush2.msra.mxu1 %v1382_v22  ;;  %v1308_v41 = vadd.f32 %v1244_v38, %v1034_v37  ;;  %v1432_v37 = vld [vmem:[%s3856_s3 + $0x110] sm:$0xff] }
 0x190   : > { %v872_v59 = vpop.permute.xlu1 %871  ;;  %v1381_v27 = vmax.f32 %v1317_v49, 0.0  ;;  %v1380_v13 = vmax.f32 %v1316_v51, 0.0  ;;  %v1373_v17 = vmax.f32 %v1309_v4, 0.0  ;;  %v1403_v4 = vld [vmem:[%s3856_s3 + $0x28] sm:$0xff] }
 0x191   : > { %v974_v48 = vmul.f32 %v2966_v25, %v872_v59  ;;  %v975_v3 = vmul.f32 %v2959_v57, %v872_v59  ;;  %v1372_v44 = vmax.f32 %v1308_v41, 0.0  ;;  %v532_v59 = vmul.f32 %v2857_v29, %v3972_v1  ;;  %v1434_v41 = vld [vmem:[%s3856_s3 + $0x120] sm:$0xff] }
 0x192   : > { %1702 = vmatprep.subr.mxu0 %v1381_v27  ;;  %2109 = vmatprep.subr.mxu1 %v1381_v27  ;;  %v533_v27 = vmul.f32 %v2859_v10, %v3972_v1  ;;  %v1409_v1 = vld [vmem:[%s3856_s3 + $0x58] sm:$0xff] }
 0x193   : > { %1703 = vmatpush2.msra.mxu0 %v1380_v13  ;;  %2141 = vmatpush2.msra.mxu1 %v1380_v13  ;;  %v1038_v21 = vadd.f32 %v974_v48, %v764_v40  ;;  %v1039_v50 = vadd.f32 %v975_v3, %v765_v31  ;;  %v756_v47 = vadd.f32 %v3975_v61, %v532_v59  ;;  %v3976_v31 = vld [vmem:[#allocation6_spill] sm:$0xff]  ;;  %v1441_v59 = vld [vmem:[%s3856_s3 + $0x158] sm:$0xff] }
 0x194   : > { %v868_v30 = vpop.permute.xlu1 %867  ;;  %1704 = vmatprep.subr.mxu0 %v1379_v45  ;;  %2110 = vmatprep.subr.mxu1 %v1379_v45  ;;  %v757_v40 = vadd.f32 %v3975_v61, %v533_v27  ;;  %v530_v18 = vmul.f32 %v2857_v29, %v3976_v31  ;;  %v531_v7 = vmul.f32 %v2859_v10, %v3976_v31  ;;  %v1408_v27 = vld [vmem:[%s3856_s3 + $0x50] sm:$0xff]  ;;  %v1447_v61 = vld [vmem:[%s3856_s3 + $0x188] sm:$0xff]  ;;  %v1417_v31 = vld [vmem:[%s3856_s3 + $0x98] sm:$0xff] }
 0x195   : > { %1705 = vmatpush2.msra.mxu0 %v1378_v53  ;;  %2142 = vmatpush2.msra.mxu1 %v1378_v53  ;;  %v972_v26 = vmul.f32 %v2966_v25, %v868_v30  ;;  %v973_v14 = vmul.f32 %v2959_v57, %v868_v30  ;;  %v852_v30 = vpop.permute.xlu0 %851 }
 0x196   : > { %v754_v29 = vadd.f32 %v3977_v9, %v530_v18  ;;  %v755_v11 = vadd.f32 %v3977_v9, %v531_v7  ;;  %v1449_v18 = vld [vmem:[%s3856_s3 + $0x198] sm:$0xff]  ;;  %v1416_v7 = vld [vmem:[%s3856_s3 + $0x90] sm:$0xff]  ;;  %v1422_v9 = vld [vmem:[%s3856_s3 + $0xc0] sm:$0xff] }
 0x197   : > { %v1036_v15 = vadd.f32 %v972_v26, %v3970_v32  ;;  %v1037_v58 = vadd.f32 %v973_v14, %v3971_v16  ;;  %v964_v14 = vmul.f32 %v2966_v25, %v852_v30 }
 0x199   : > { %v1146_v33 = vpop.permute.xlu1 %1145 }
 0x19a   : > { %v1248_v42 = vmul.f32 %v2982_v8, %v1146_v33  ;;  %v1249_v19 = vmul.f32 %v2996_v12, %v1146_v33  ;;  %v965_v33 = vmul.f32 %v2959_v57, %v852_v30  ;;  %v1410_v30 = vld [vmem:[%s3856_s3 + $0x60] sm:$0xff] }
 0x19c   : > { %v1312_v23 = vadd.f32 %v1248_v42, %v1038_v21  ;;  %v1313_v2 = vadd.f32 %v1249_v19, %v1039_v50 }
 0x19d   : > { %v1142_v6 = vpop.permute.xlu1 %1141 }
 0x19e   : > { %v1246_v54 = vmul.f32 %v2982_v8, %v1142_v6  ;;  %v1247_v43 = vmul.f32 %v2996_v12, %v1142_v6  ;;  %v1377_v52 = vmax.f32 %v1313_v2, 0.0  ;;  %v1376_v0 = vmax.f32 %v1312_v23, 0.0 }
 0x19f   : > { %v1029_v2 = vadd.f32 %v965_v33, %v755_v11  ;;  %v1418_v33 = vld [vmem:[%s3856_s3 + $0xa0] sm:$0xff]  ;;  %v1425_v11 = vld [vmem:[%s3856_s3 + $0xd8] sm:$0xff] }
 0x1a0   : > { %v1310_v36 = vadd.f32 %v1246_v54, %v1036_v15  ;;  %v1311_v55 = vadd.f32 %v1247_v43, %v1037_v58  ;;  %1706 = vmatprep.subr.mxu0 %v1377_v52  ;;  %2111 = vmatprep.subr.mxu1 %v1377_v52  ;;  %v1398_v43 = vld [vmem:[%s3856_s3] sm:$0xff]  ;;  %v1433_v52 = vld [vmem:[%s3856_s3 + $0x118] sm:$0xff] }
 0x1a1   : > { %1707 = vmatpush2.msra.mxu0 %v1376_v0  ;;  %2143 = vmatpush2.msra.mxu1 %v1376_v0  ;;  %v1400_v0 = vld [vmem:[%s3856_s3 + $0x10] sm:$0xff] }
 0x1a2   : > { %v860_v24 = vpop.permute.xlu1 %859  ;;  %v1375_v5 = vmax.f32 %v1311_v55, 0.0  ;;  %v1374_v22 = vmax.f32 %v1310_v36, 0.0  ;;  %v1435_v36 = vld [vmem:[%s3856_s3 + $0x128] sm:$0xff]  ;;  %v1402_v55 = vld [vmem:[%s3856_s3 + $0x20] sm:$0xff] }
 0x1a3   : > { %v968_v51 = vmul.f32 %v2966_v25, %v860_v24  ;;  %v969_v49 = vmul.f32 %v2959_v57, %v860_v24  ;;  %v1405_v24 = vld [vmem:[%s3856_s3 + $0x38] sm:$0xff] }
 0x1a4   : > { %1708 = vmatprep.subr.mxu0 %v1375_v5  ;;  %2112 = vmatprep.subr.mxu1 %v1375_v5  ;;  %v1437_v5 = vld [vmem:[%s3856_s3 + $0x138] sm:$0xff] }
 0x1a5   : > { %1709 = vmatpush2.msra.mxu0 %v1374_v22  ;;  %2144 = vmatpush2.msra.mxu1 %v1374_v22  ;;  %v1032_v35 = vadd.f32 %v968_v51, %v3973_v62  ;;  %v1033_v48 = vadd.f32 %v969_v49, %v3974_v34  ;;  %v1404_v22 = vld [vmem:[%s3856_s3 + $0x30] sm:$0xff]  ;;  %v1406_v51 = vld [vmem:[%s3856_s3 + $0x40] sm:$0xff]  ;;  %v1445_v34 = vld [vmem:[%s3856_s3 + $0x178] sm:$0xff] }
 0x1a6   : > { %v856_v46 = vpop.permute.xlu1 %855  ;;  %1710 = vmatprep.subr.mxu0 %v1373_v17  ;;  %2113 = vmatprep.subr.mxu1 %v1373_v17  ;;  %v1436_v17 = vld [vmem:[%s3856_s3 + $0x130] sm:$0xff]  ;;  %v1438_v49 = vld [vmem:[%s3856_s3 + $0x140] sm:$0xff] }
 0x1a7   : > { %1711 = vmatpush2.msra.mxu0 %v1372_v44  ;;  %2145 = vmatpush2.msra.mxu1 %v1372_v44  ;;  %v966_v13 = vmul.f32 %v2966_v25, %v856_v46  ;;  %v967_v45 = vmul.f32 %v2959_v57, %v856_v46  ;;  %v1028_v25 = vadd.f32 %v964_v14, %v754_v29  ;;  %v1407_v44 = vld [vmem:[%s3856_s3 + $0x48] sm:$0xff]  ;;  %v1442_v62 = vld [vmem:[%s3856_s3 + $0x160] sm:$0xff] }
 0x1a8   : > { %v1439_v46 = vld [vmem:[%s3856_s3 + $0x148] sm:$0xff]  ;;  %v1454_v29 = vld [vmem:[%s3856_s3 + $0x1c0] sm:$0xff] }
 0x1a9   : > { %v1030_v21 = vadd.f32 %v966_v13, %v756_v47  ;;  %v1031_v50 = vadd.f32 %v967_v45, %v757_v40  ;;  %v1440_v13 = vld [vmem:[%s3856_s3 + $0x150] sm:$0xff]  ;;  %v1411_v45 = vld [vmem:[%s3856_s3 + $0x68] sm:$0xff]  ;;  %v1414_v47 = vld [vmem:[%s3856_s3 + $0x80] sm:$0xff] }
 0x1aa   : > { %v1446_v40 = vld [vmem:[%s3856_s3 + $0x180] sm:$0xff]  ;;  %v1451_v14 = vld [vmem:[%s3856_s3 + $0x1a8] sm:$0xff] }
 0x1ab   : > { %v1134_v53 = vpop.permute.xlu1 %1133 }
 0x1ac   : > { %v1242_v3 = vmul.f32 %v2982_v8, %v1134_v53  ;;  %v1243_v28 = vmul.f32 %v2996_v12, %v1134_v53  ;;  %v1443_v53 = vld [vmem:[%s3856_s3 + $0x168] sm:$0xff] }
 0x1ae   : > { %v1306_v56 = vadd.f32 %v1242_v3, %v1032_v35  ;;  %v1307_v26 = vadd.f32 %v1243_v28, %v1033_v48  ;;  %v1413_v35 = vld [vmem:[%s3856_s3 + $0x78] sm:$0xff]  ;;  %v1412_v48 = vld [vmem:[%s3856_s3 + $0x70] sm:$0xff]  ;;  %v1415_v28 = vld [vmem:[%s3856_s3 + $0x88] sm:$0xff] }
 0x1af   : > { %v1130_v42 = vpop.permute.xlu1 %1129  ;;  %v1444_v3 = vld [vmem:[%s3856_s3 + $0x170] sm:$0xff] }
 0x1b0   : > { %v1240_v19 = vmul.f32 %v2982_v8, %v1130_v42  ;;  %v1241_v63 = vmul.f32 %v2996_v12, %v1130_v42  ;;  %v1371_v39 = vmax.f32 %v1307_v26, 0.0  ;;  %v1370_v60 = vmax.f32 %v1306_v56, 0.0  ;;  %v1448_v56 = vld [vmem:[%s3856_s3 + $0x190] sm:$0xff]  ;;  %v1419_v26 = vld [vmem:[%s3856_s3 + $0xa8] sm:$0xff]  ;;  %v1453_v42 = vld [vmem:[%s3856_s3 + $0x1b8] sm:$0xff] }
 0x1b2   : > { %v1304_v10 = vadd.f32 %v1240_v19, %v1030_v21  ;;  %v1305_v23 = vadd.f32 %v1241_v63, %v1031_v50  ;;  %1712 = vmatprep.subr.mxu0 %v1371_v39  ;;  %2114 = vmatprep.subr.mxu1 %v1371_v39  ;;  %v1450_v21 = vld [vmem:[%s3856_s3 + $0x1a0] sm:$0xff]  ;;  %v1421_v50 = vld [vmem:[%s3856_s3 + $0xb8] sm:$0xff]  ;;  %v1420_v19 = vld [vmem:[%s3856_s3 + $0xb0] sm:$0xff] }
 0x1b3   : > { %v1126_v57 = vpop.permute.xlu1 %1125  ;;  %1713 = vmatpush2.msra.mxu0 %v1370_v60  ;;  %2146 = vmatpush2.msra.mxu1 %v1370_v60  ;;  %v1452_v63 = vld [vmem:[%s3856_s3 + $0x1b0] sm:$0xff]  ;;  %v1423_v39 = vld [vmem:[%s3856_s3 + $0xc8] sm:$0xff] }
 0x1b4   : > { %v1238_v20 = vmul.f32 %v2982_v8, %v1126_v57  ;;  %v1239_v38 = vmul.f32 %v2996_v12, %v1126_v57  ;;  %v1369_v32 = vmax.f32 %v1305_v23, 0.0  ;;  %v1368_v15 = vmax.f32 %v1304_v10, 0.0  ;;  %v1430_v8 = vld [vmem:[%s3856_s3 + $0x100] sm:$0xff]  ;;  %v1401_v12 = vld [vmem:[%s3856_s3 + $0x18] sm:$0xff]  ;;  %v1455_v60 = vld [vmem:[%s3856_s3 + $0x1c8] sm:$0xff] }
 0x1b5   : > { %v1457_v10 = vld [vmem:[%s3856_s3 + $0x1d8] sm:$0xff]  ;;  %v1424_v23 = vld [vmem:[%s3856_s3 + $0xd0] sm:$0xff]  ;;  %v1459_v57 = vld [vmem:[%s3856_s3 + $0x1e8] sm:$0xff] }
 0x1b6   : > { %v1302_v16 = vadd.f32 %v1238_v20, %v1028_v25  ;;  %v1303_v58 = vadd.f32 %v1239_v38, %v1029_v2  ;;  %1714 = vmatprep.subr.mxu0 %v1369_v32  ;;  %2115 = vmatprep.subr.mxu1 %v1369_v32  ;;  %v1456_v25 = vld [vmem:[%s3856_s3 + $0x1d0] sm:$0xff]  ;;  %v1427_v2 = vld [vmem:[%s3856_s3 + $0xe8] sm:$0xff]  ;;  %v1426_v20 = vld [vmem:[%s3856_s3 + $0xe0] sm:$0xff] }
 0x1b7   : > { %1715 = vmatpush2.msra.mxu0 %v1368_v15  ;;  %2147 = vmatpush2.msra.mxu1 %v1368_v15  ;;  %v1458_v38 = vld [vmem:[%s3856_s3 + $0x1e0] sm:$0xff]  ;;  %v1429_v32 = vld [vmem:[%s3856_s3 + $0xf8] sm:$0xff] }
 0x1b8   : > { %v1367_v6 = vmax.f32 %v1303_v58, 0.0  ;;  %v1366_v54 = vmax.f32 %v1302_v16, 0.0  ;;  %v1461_v15 = vld [vmem:[%s3856_s3 + $0x1f8] sm:$0xff]  ;;  %v1428_v16 = vld [vmem:[%s3856_s3 + $0xf0] sm:$0xff] }
 0x1b9   : > { %v1460_v58 = vld [vmem:[%s3856_s3 + $0x1f0] sm:$0xff] }
 0x1ba   : > { %1716 = vmatprep.subr.mxu0 %v1367_v6  ;;  %2116 = vmatprep.subr.mxu1 %v1367_v6  ;;  %v1502_v6 = vpop.permute.xlu1 %1501 }
 0x1bb   : > { %1717 = vmatpush2.msra.mxu0 %v1366_v54  ;;  %2148 = vmatpush2.msra.mxu1 %v1366_v54 }
 0x1bc   : > { %1719 = vmatmul.mubr.f32.vlgmr.msra.gmra.mxu0 %v1398_v43  ;;  %1815 = vmatmul.mubr.f32.vlgmr.msra.gmra.mxu1 %v1430_v8 }
 0x1bd   : > { %1724 = vmatprep.mubr.f32.mxu0 %v1401_v12  ;;  %1820 = vmatprep.mubr.f32.mxu1 %v1433_v52  ;;  %v1497_v54 = vpop.permute.xlu0 %1496 }
 0x1be   : > { %v1507_v43 = vpop.permute.xlu1 %1506 }
 0x1c0   : > { %1725 = vmatmul.mubr.f32.gmra.mxu0 %v1400_v0  ;;  %1821 = vmatmul.mubr.f32.gmra.mxu1 %v1432_v37 }
 0x1c1   : > { %1730 = vmatprep.mubr.f32.mxu0 %v1403_v4  ;;  %1826 = vmatprep.mubr.f32.mxu1 %v1435_v36  ;;  %v3676_v8 = vpop.permute.xlu0 %1511 }
 0x1c2   : > { %v3678_v12 = vpop.permute.xlu1 %1516 }
 0x1c4   : > { %1731 = vmatmul.mubr.f32.gmra.mxu0 %v1402_v55  ;;  %1827 = vmatmul.mubr.f32.gmra.mxu1 %v1434_v41 }
 0x1c5   : > { %1736 = vmatprep.mubr.f32.mxu0 %v1405_v24  ;;  %1832 = vmatprep.mubr.f32.mxu1 %v1437_v5  ;;  %v3680_v52 = vpop.permute.xlu0 %1521 }
 0x1c8   : > { %1737 = vmatmul.mubr.f32.gmra.mxu0 %v1404_v22  ;;  %1833 = vmatmul.mubr.f32.gmra.mxu1 %v1436_v17 }
 0x1c9   : > { %1742 = vmatprep.mubr.f32.mxu0 %v1407_v44  ;;  %1838 = vmatprep.mubr.f32.mxu1 %v1439_v46  ;;  %v3682_v0 = vpop.permute.xlu1 %1526  ;;  %v3684_v37 = vpop.permute.xlu0 %1531 }
 0x1cc   : > { %1743 = vmatmul.mubr.f32.gmra.mxu0 %v1406_v51  ;;  %1839 = vmatmul.mubr.f32.gmra.mxu1 %v1438_v49 }
 0x1cd   : > { %1748 = vmatprep.mubr.f32.mxu0 %v1409_v1  ;;  %1844 = vmatprep.mubr.f32.mxu1 %v1441_v59  ;;  %v3686_v4 = vpop.permute.xlu1 %1536  ;;  %v3688_v36 = vpop.permute.xlu0 %1541 }
 0x1d0   : > { %1749 = vmatmul.mubr.f32.gmra.mxu0 %v1408_v27  ;;  %1845 = vmatmul.mubr.f32.gmra.mxu1 %v1440_v13 }
 0x1d1   : > { %1754 = vmatprep.mubr.f32.mxu0 %v1411_v45  ;;  %1850 = vmatprep.mubr.f32.mxu1 %v1443_v53  ;;  %v3690_v55 = vpop.permute.xlu1 %1546 }
 0x1d2   : > { %v3692_v41 = vpop.permute.xlu0 %1551 }
 0x1d4   : > { %1755 = vmatmul.mubr.f32.gmra.mxu0 %v1410_v30  ;;  %1851 = vmatmul.mubr.f32.gmra.mxu1 %v1442_v62 }
 0x1d5   : > { %1760 = vmatprep.mubr.f32.mxu0 %v1413_v35  ;;  %1856 = vmatprep.mubr.f32.mxu1 %v1445_v34  ;;  %v3694_v24 = vpop.permute.xlu1 %1556 }
 0x1d6   : > { %v3696_v5 = vpop.permute.xlu0 %1561 }
 0x1d8   : > { %1761 = vmatmul.mubr.f32.gmra.mxu0 %v1412_v48  ;;  %1857 = vmatmul.mubr.f32.gmra.mxu1 %v1444_v3 }
 0x1d9   : > { %1766 = vmatprep.mubr.f32.mxu0 %v1415_v28  ;;  %1862 = vmatprep.mubr.f32.mxu1 %v1447_v61  ;;  %v3698_v22 = vpop.permute.xlu1 %1566 }
 0x1da   : > { %v3701_v17 = vpop.permute.xlu0 %1571 }
 0x1dc   : > { %1767 = vmatmul.mubr.f32.gmra.mxu0 %v1414_v47  ;;  %1863 = vmatmul.mubr.f32.gmra.mxu1 %v1446_v40 }
 0x1dd   : > { %1772 = vmatprep.mubr.f32.mxu0 %v1417_v31  ;;  %1868 = vmatprep.mubr.f32.mxu1 %v1449_v18 }
 0x1df   : > { %v1577_v44 = vpop.permute.xlu1 %1576  ;;  %v1582_v13 = vpop.permute.xlu0 %1581 }
 0x1e0   : > { %1773 = vmatmul.mubr.f32.gmra.mxu0 %v1416_v7  ;;  %1869 = vmatmul.mubr.f32.gmra.mxu1 %v1448_v56 }
 0x1e1   : > { %1778 = vmatprep.mubr.f32.mxu0 %v1419_v26  ;;  %1874 = vmatprep.mubr.f32.mxu1 %v1451_v14 }
 0x1e3   : > { %v1587_v28 = vpop.permute.xlu1 %1586  ;;  %v1592_v14 = vpop.permute.xlu0 %1591 }
 0x1e4   : > { %1779 = vmatmul.mubr.f32.gmra.mxu0 %v1418_v33  ;;  %1875 = vmatmul.mubr.f32.gmra.mxu1 %v1450_v21 }
 0x1e5   : > { %1784 = vmatprep.mubr.f32.mxu0 %v1421_v50  ;;  %1880 = vmatprep.mubr.f32.mxu1 %v1453_v42 }
 0x1e8   : > { %1785 = vmatmul.mubr.f32.gmra.mxu0 %v1420_v19  ;;  %1881 = vmatmul.mubr.f32.gmra.mxu1 %v1452_v63 }
 0x1e9   : > { %1790 = vmatprep.mubr.f32.mxu0 %v1423_v39  ;;  %1886 = vmatprep.mubr.f32.mxu1 %v1455_v60 }
 0x1ec   : > { %1791 = vmatmul.mubr.f32.gmra.mxu0 %v1422_v9  ;;  %1887 = vmatmul.mubr.f32.gmra.mxu1 %v1454_v29  ;;  %v1597_v9 = vpop.permute.xlu1 %1596 }
 0x1ed   : > { %1796 = vmatprep.mubr.f32.mxu0 %v1425_v11  ;;  %1892 = vmatprep.mubr.f32.mxu1 %v1457_v10 }
 0x1f0   : > { %1797 = vmatmul.mubr.f32.gmra.mxu0 %v1424_v23  ;;  %1893 = vmatmul.mubr.f32.gmra.mxu1 %v1456_v25 }
 0x1f1   : > { %1802 = vmatprep.mubr.f32.mxu0 %v1427_v2  ;;  %1898 = vmatprep.mubr.f32.mxu1 %v1459_v57 }
 0x1f4   : > { %1803 = vmatmul.mubr.f32.gmra.mxu0 %v1426_v20  ;;  %1899 = vmatmul.mubr.f32.gmra.mxu1 %v1458_v38  ;;  %v1602_v38 = vpop.permute.xlu0 %1601 }
 0x1f5   : > { %1808 = vmatprep.mubr.f32.mxu0 %v1429_v32  ;;  %1904 = vmatprep.mubr.f32.mxu1 %v1461_v15 }
 0x1f8   : > { %1809 = vmatmul.mubr.f32.gmra.mxu0 %v1428_v16  ;;  %1905 = vmatmul.mubr.f32.gmra.mxu1 %v1460_v58 }
 0x27c   : > { %v1720_v46 = vpop.f32.mrf.mxu0  ;;  %v1816_v51 = vpop.f32.mrf.mxu1 }
 0x27d   : > { %v1721_v49 = vadd.f32 %v1720_v46, %v1497_v54  ;;  %v1817_v1 = vadd.f32 %v1816_v51, %v1577_v44 }
 0x27e   : > { %v1722_v59 = vpop.f32.mrf.mxu0  ;;  %v1818_v27 = vpop.f32.mrf.mxu1 }
 0x27f   : > { %1911 = vst [vmem:[%s3705_s25] sm:$0xff] %v1721_v49  ;;  %1943 = vst [vmem:[%s3705_s25 + $0x100] sm:$0xff] %v1817_v1  ;;  %v1723_v45 = vadd.f32 %v1722_v59, %v1497_v54  ;;  %v1819_v53 = vadd.f32 %v1818_v27, %v1577_v44  ;;  %v1607_v44 = vpop.permute.xlu1 %1606 }
 0x280   : > { %v1726_v30 = vpop.f32.mrf.mxu0  ;;  %v1822_v62 = vpop.f32.mrf.mxu1 }
 0x281   : > { %1912 = vst [vmem:[%s3705_s25 + $0x8] sm:$0xff] %v1723_v45  ;;  %1944 = vst [vmem:[%s3705_s25 + $0x108] sm:$0xff] %v1819_v53  ;;  %v1727_v35 = vadd.f32 %v1726_v30, %v1502_v6  ;;  %v1823_v34 = vadd.f32 %v1822_v62, %v1582_v13  ;;  %v1612_v45 = vpop.permute.xlu0 %1611 }
 0x282   : > { %v1728_v48 = vpop.f32.mrf.mxu0  ;;  %v1824_v3 = vpop.f32.mrf.mxu1 }
 0x283   : > { %1913 = vst [vmem:[%s3705_s25 + $0x10] sm:$0xff] %v1727_v35  ;;  %1945 = vst [vmem:[%s3705_s25 + $0x110] sm:$0xff] %v1823_v34  ;;  %v1729_v61 = vadd.f32 %v1728_v48, %v1502_v6  ;;  %v1825_v47 = vadd.f32 %v1824_v3, %v1582_v13 }
 0x284   : > { %v1732_v40 = vpop.f32.mrf.mxu0  ;;  %v1828_v31 = vpop.f32.mrf.mxu1 }
 0x285   : > { %1914 = vst [vmem:[%s3705_s25 + $0x18] sm:$0xff] %v1729_v61  ;;  %1946 = vst [vmem:[%s3705_s25 + $0x118] sm:$0xff] %v1825_v47  ;;  %v1733_v18 = vadd.f32 %v1732_v40, %v1507_v43  ;;  %v1829_v7 = vadd.f32 %v1828_v31, %v1587_v28 }
 0x286   : > { %v1734_v56 = vpop.f32.mrf.mxu0  ;;  %v1830_v26 = vpop.f32.mrf.mxu1 }
 0x287   : > { %1915 = vst [vmem:[%s3705_s25 + $0x20] sm:$0xff] %v1733_v18  ;;  %1947 = vst [vmem:[%s3705_s25 + $0x120] sm:$0xff] %v1829_v7  ;;  %v1735_v33 = vadd.f32 %v1734_v56, %v1507_v43  ;;  %v1831_v21 = vadd.f32 %v1830_v26, %v1587_v28  ;;  %v1617_v28 = vpop.permute.xlu1 %1616  ;;  %v1622_v26 = vpop.permute.xlu0 %1621 }
 0x288   : > { %v1738_v50 = vpop.f32.mrf.mxu0  ;;  %v1834_v42 = vpop.f32.mrf.mxu1 }
 0x289   : > { %1916 = vst [vmem:[%s3705_s25 + $0x28] sm:$0xff] %v1735_v33  ;;  %1948 = vst [vmem:[%s3705_s25 + $0x128] sm:$0xff] %v1831_v21  ;;  %v1739_v19 = vadd.f32 %v1738_v50, %v3676_v8  ;;  %v1835_v63 = vadd.f32 %v1834_v42, %v1592_v14 }
 0x28a   : > { %v1740_v39 = vpop.f32.mrf.mxu0  ;;  %v1836_v60 = vpop.f32.mrf.mxu1 }
 0x28b   : > { %1917 = vst [vmem:[%s3705_s25 + $0x30] sm:$0xff] %v1739_v19  ;;  %1949 = vst [vmem:[%s3705_s25 + $0x130] sm:$0xff] %v1835_v63  ;;  %v1741_v29 = vadd.f32 %v1740_v39, %v3676_v8  ;;  %v1837_v11 = vadd.f32 %v1836_v60, %v1592_v14  ;;  %v1627_v39 = vpop.permute.xlu1 %1626 }
 0x28c   : > { %v1744_v10 = vpop.f32.mrf.mxu0  ;;  %v1840_v23 = vpop.f32.mrf.mxu1 }
 0x28d   : > { %1918 = vst [vmem:[%s3705_s25 + $0x38] sm:$0xff] %v1741_v29  ;;  %1950 = vst [vmem:[%s3705_s25 + $0x138] sm:$0xff] %v1837_v11  ;;  %v1745_v25 = vadd.f32 %v1744_v10, %v3678_v12  ;;  %v1841_v2 = vadd.f32 %v1840_v23, %v1597_v9 }
 0x28e   : > { %v1746_v57 = vpop.f32.mrf.mxu0  ;;  %v1842_v20 = vpop.f32.mrf.mxu1 }
 0x28f   : > { %1919 = vst [vmem:[%s3705_s25 + $0x40] sm:$0xff] %v1745_v25  ;;  %1951 = vst [vmem:[%s3705_s25 + $0x140] sm:$0xff] %v1841_v2  ;;  %v1747_v32 = vadd.f32 %v1746_v57, %v3678_v12  ;;  %v1843_v15 = vadd.f32 %v1842_v20, %v1597_v9  ;;  %v1632_v2 = vpop.permute.xlu0 %1631 }
 0x290   : > { %v1750_v16 = vpop.f32.mrf.mxu0  ;;  %v1846_v58 = vpop.f32.mrf.mxu1 }
 0x291   : > { %1920 = vst [vmem:[%s3705_s25 + $0x48] sm:$0xff] %v1747_v32  ;;  %1952 = vst [vmem:[%s3705_s25 + $0x148] sm:$0xff] %v1843_v15  ;;  %v1751_v6 = vadd.f32 %v1750_v16, %v3680_v52  ;;  %v1847_v54 = vadd.f32 %v1846_v58, %v1602_v38 }
 0x292   : > { %v1752_v43 = vpop.f32.mrf.mxu0  ;;  %v1848_v8 = vpop.f32.mrf.mxu1 }
 0x293   : > { %1921 = vst [vmem:[%s3705_s25 + $0x50] sm:$0xff] %v1751_v6  ;;  %1953 = vst [vmem:[%s3705_s25 + $0x150] sm:$0xff] %v1847_v54  ;;  %v1753_v46 = vadd.f32 %v1752_v43, %v3680_v52  ;;  %v1849_v12 = vadd.f32 %v1848_v8, %v1602_v38  ;;  %v1637_v6 = vpop.permute.xlu1 %1636 }
 0x294   : > { %v1756_v51 = vpop.f32.mrf.mxu0  ;;  %v1852_v49 = vpop.f32.mrf.mxu1 }
 0x295   : > { %1922 = vst [vmem:[%s3705_s25 + $0x58] sm:$0xff] %v1753_v46  ;;  %1954 = vst [vmem:[%s3705_s25 + $0x158] sm:$0xff] %v1849_v12  ;;  %v1757_v1 = vadd.f32 %v1756_v51, %v3682_v0  ;;  %v1853_v59 = vadd.f32 %v1852_v49, %v1607_v44  ;;  %v1642_v49 = vpop.permute.xlu0 %1641 }
 0x296   : > { %v1758_v27 = vpop.f32.mrf.mxu0  ;;  %v1854_v13 = vpop.f32.mrf.mxu1 }
 0x297   : > { %1923 = vst [vmem:[%s3705_s25 + $0x60] sm:$0xff] %v1757_v1  ;;  %1955 = vst [vmem:[%s3705_s25 + $0x160] sm:$0xff] %v1853_v59  ;;  %v1759_v53 = vadd.f32 %v1758_v27, %v3682_v0  ;;  %v1855_v52 = vadd.f32 %v1854_v13, %v1607_v44 }
 0x298   : > { %v1762_v30 = vpop.f32.mrf.mxu0  ;;  %v1858_v62 = vpop.f32.mrf.mxu1 }
 0x299   : > { %1924 = vst [vmem:[%s3705_s25 + $0x68] sm:$0xff] %v1759_v53  ;;  %1956 = vst [vmem:[%s3705_s25 + $0x168] sm:$0xff] %v1855_v52  ;;  %v1763_v35 = vadd.f32 %v1762_v30, %v3684_v37  ;;  %v1859_v34 = vadd.f32 %v1858_v62, %v1612_v45  ;;  %v1647_v30 = vpop.permute.xlu1 %1646 }
 0x29a   : > { %v1764_v48 = vpop.f32.mrf.mxu0  ;;  %v1860_v3 = vpop.f32.mrf.mxu1 }
 0x29b   : > { %1925 = vst [vmem:[%s3705_s25 + $0x70] sm:$0xff] %v1763_v35  ;;  %1957 = vst [vmem:[%s3705_s25 + $0x170] sm:$0xff] %v1859_v34  ;;  %v1765_v61 = vadd.f32 %v1764_v48, %v3684_v37  ;;  %v1861_v0 = vadd.f32 %v1860_v3, %v1612_v45 }
 0x29c   : > { %v1768_v47 = vpop.f32.mrf.mxu0  ;;  %v1864_v40 = vpop.f32.mrf.mxu1 }
 0x29d   : > { %1926 = vst [vmem:[%s3705_s25 + $0x78] sm:$0xff] %v1765_v61  ;;  %1958 = vst [vmem:[%s3705_s25 + $0x178] sm:$0xff] %v1861_v0  ;;  %v1769_v31 = vadd.f32 %v1768_v47, %v3686_v4  ;;  %v1865_v18 = vadd.f32 %v1864_v40, %v1617_v28  ;;  %v1652_v0 = vpop.permute.xlu0 %1651 }
 0x29e   : > { %v1770_v7 = vpop.f32.mrf.mxu0  ;;  %v1866_v56 = vpop.f32.mrf.mxu1 }
 0x29f   : > { %1927 = vst [vmem:[%s3705_s25 + $0x80] sm:$0xff] %v1769_v31  ;;  %1959 = vst [vmem:[%s3705_s25 + $0x180] sm:$0xff] %v1865_v18  ;;  %v1771_v14 = vadd.f32 %v1770_v7, %v3686_v4  ;;  %v1867_v37 = vadd.f32 %v1866_v56, %v1617_v28 }
 0x2a0   : > { %v1774_v33 = vpop.f32.mrf.mxu0  ;;  %v1870_v21 = vpop.f32.mrf.mxu1 }
 0x2a1   : > { %1928 = vst [vmem:[%s3705_s25 + $0x88] sm:$0xff] %v1771_v14  ;;  %1960 = vst [vmem:[%s3705_s25 + $0x188] sm:$0xff] %v1867_v37  ;;  %v1775_v50 = vadd.f32 %v1774_v33, %v3688_v36  ;;  %v1871_v42 = vadd.f32 %v1870_v21, %v1622_v26 }
 0x2a2   : > { %v1776_v19 = vpop.f32.mrf.mxu0  ;;  %v1872_v63 = vpop.f32.mrf.mxu1 }
 0x2a3   : > { %1929 = vst [vmem:[%s3705_s25 + $0x90] sm:$0xff] %v1775_v50  ;;  %1961 = vst [vmem:[%s3705_s25 + $0x190] sm:$0xff] %v1871_v42  ;;  %v1777_v60 = vadd.f32 %v1776_v19, %v3688_v36  ;;  %v1873_v4 = vadd.f32 %v1872_v63, %v1622_v26 }
 0x2a4   : > { %v1780_v9 = vpop.f32.mrf.mxu0  ;;  %v1876_v29 = vpop.f32.mrf.mxu1 }
 0x2a5   : > { %1930 = vst [vmem:[%s3705_s25 + $0x98] sm:$0xff] %v1777_v60  ;;  %1962 = vst [vmem:[%s3705_s25 + $0x198] sm:$0xff] %v1873_v4  ;;  %v1781_v11 = vadd.f32 %v1780_v9, %v3690_v55  ;;  %v1877_v10 = vadd.f32 %v1876_v29, %v1627_v39 }
 0x2a6   : > { %v1782_v23 = vpop.f32.mrf.mxu0  ;;  %v1878_v25 = vpop.f32.mrf.mxu1 }
 0x2a7   : > { %1931 = vst [vmem:[%s3705_s25 + $0xa0] sm:$0xff] %v1781_v11  ;;  %1963 = vst [vmem:[%s3705_s25 + $0x1a0] sm:$0xff] %v1877_v10  ;;  %v1783_v57 = vadd.f32 %v1782_v23, %v3690_v55  ;;  %v1879_v36 = vadd.f32 %v1878_v25, %v1627_v39 }
 0x2a8   : > { %v1786_v20 = vpop.f32.mrf.mxu0  ;;  %v1882_v38 = vpop.f32.mrf.mxu1 }
 0x2a9   : > { %1932 = vst [vmem:[%s3705_s25 + $0xa8] sm:$0xff] %v1783_v57  ;;  %1964 = vst [vmem:[%s3705_s25 + $0x1a8] sm:$0xff] %v1879_v36  ;;  %v1787_v32 = vadd.f32 %v1786_v20, %v3692_v41  ;;  %v1883_v15 = vadd.f32 %v1882_v38, %v1632_v2 }
 0x2aa   : > { %v1788_v16 = vpop.f32.mrf.mxu0  ;;  %v1884_v58 = vpop.f32.mrf.mxu1 }
 0x2ab   : > { %1933 = vst [vmem:[%s3705_s25 + $0xb0] sm:$0xff] %v1787_v32  ;;  %1965 = vst [vmem:[%s3705_s25 + $0x1b0] sm:$0xff] %v1883_v15  ;;  %v1789_v54 = vadd.f32 %v1788_v16, %v3692_v41  ;;  %v1885_v55 = vadd.f32 %v1884_v58, %v1632_v2 }
 0x2ac   : > { %v1792_v43 = vpop.f32.mrf.mxu0  ;;  %v1888_v8 = vpop.f32.mrf.mxu1 }
 0x2ad   : > { %1934 = vst [vmem:[%s3705_s25 + $0xb8] sm:$0xff] %v1789_v54  ;;  %1966 = vst [vmem:[%s3705_s25 + $0x1b8] sm:$0xff] %v1885_v55  ;;  %v1793_v44 = vadd.f32 %v1792_v43, %v3694_v24  ;;  %v1889_v46 = vadd.f32 %v1888_v8, %v1637_v6 }
 0x2ae   : > { %v1794_v12 = vpop.f32.mrf.mxu0  ;;  %v1890_v51 = vpop.f32.mrf.mxu1 }
 0x2af   : > { %1935 = vst [vmem:[%s3705_s25 + $0xc0] sm:$0xff] %v1793_v44  ;;  %1967 = vst [vmem:[%s3705_s25 + $0x1c0] sm:$0xff] %v1889_v46  ;;  %v1795_v1 = vadd.f32 %v1794_v12, %v3694_v24  ;;  %v1891_v41 = vadd.f32 %v1890_v51, %v1637_v6 }
 0x2b0   : > { %v1798_v59 = vpop.f32.mrf.mxu0  ;;  %v1894_v27 = vpop.f32.mrf.mxu1 }
 0x2b1   : > { %1936 = vst [vmem:[%s3705_s25 + $0xc8] sm:$0xff] %v1795_v1  ;;  %1968 = vst [vmem:[%s3705_s25 + $0x1c8] sm:$0xff] %v1891_v41  ;;  %v1799_v13 = vadd.f32 %v1798_v59, %v3696_v5  ;;  %v1895_v45 = vadd.f32 %v1894_v27, %v1642_v49 }
 0x2b2   : > { %v1800_v53 = vpop.f32.mrf.mxu0  ;;  %v1896_v52 = vpop.f32.mrf.mxu1 }
 0x2b3   : > { %1937 = vst [vmem:[%s3705_s25 + $0xd0] sm:$0xff] %v1799_v13  ;;  %1969 = vst [vmem:[%s3705_s25 + $0x1d0] sm:$0xff] %v1895_v45  ;;  %v1801_v24 = vadd.f32 %v1800_v53, %v3696_v5  ;;  %v1897_v62 = vadd.f32 %v1896_v52, %v1642_v49 }
 0x2b4   : > { %v1804_v35 = vpop.f32.mrf.mxu0  ;;  %v1900_v34 = vpop.f32.mrf.mxu1 }
 0x2b5   : > { %1938 = vst [vmem:[%s3705_s25 + $0xd8] sm:$0xff] %v1801_v24  ;;  %1970 = vst [vmem:[%s3705_s25 + $0x1d8] sm:$0xff] %v1897_v62  ;;  %v1805_v48 = vadd.f32 %v1804_v35, %v3698_v22  ;;  %v1901_v3 = vadd.f32 %v1900_v34, %v1647_v30 }
 0x2b6   : > { %v1806_v28 = vpop.f32.mrf.mxu0  ;;  %v1902_v61 = vpop.f32.mrf.mxu1 }
 0x2b7   : > { %1939 = vst [vmem:[%s3705_s25 + $0xe0] sm:$0xff] %v1805_v48  ;;  %1971 = vst [vmem:[%s3705_s25 + $0x1e0] sm:$0xff] %v1901_v3  ;;  %v1807_v5 = vadd.f32 %v1806_v28, %v3698_v22  ;;  %v1903_v47 = vadd.f32 %v1902_v61, %v1647_v30 }
 0x2b8   : > { %v1810_v40 = vpop.f32.mrf.mxu0  ;;  %v1906_v31 = vpop.f32.mrf.mxu1 }
 0x2b9   : > { %1940 = vst [vmem:[%s3705_s25 + $0xe8] sm:$0xff] %v1807_v5  ;;  %1972 = vst [vmem:[%s3705_s25 + $0x1e8] sm:$0xff] %v1903_v47  ;;  %v1811_v18 = vadd.f32 %v1810_v40, %v3701_v17  ;;  %v1907_v7 = vadd.f32 %v1906_v31, %v1652_v0 }
 0x2ba   : > { %v1812_v56 = vpop.f32.mrf.mxu0  ;;  %v1908_v26 = vpop.f32.mrf.mxu1 }
 0x2bb   : > { %1941 = vst [vmem:[%s3705_s25 + $0xf0] sm:$0xff] %v1811_v18  ;;  %1973 = vst [vmem:[%s3705_s25 + $0x1f0] sm:$0xff] %v1907_v7  ;;  %v1813_v22 = vadd.f32 %v1812_v56, %v3701_v17  ;;  %v1909_v14 = vadd.f32 %v1908_v26, %v1652_v0 }
 0x2bd   : > { %1942 = vst [vmem:[%s3705_s25 + $0xf8] sm:$0xff] %v1813_v22  ;;  %1974 = vst [vmem:[%s3705_s25 + $0x1f8] sm:$0xff] %v1909_v14 }
 0x2be   : > { %2244 = shalt.err (!%p2241_p5)
}
 0x2bf   : > { %s2245_s14 = scalar_lea.hbm %s3797_s9, 8192  ;;  %s2249_s17 = scalar_lea.hbm %s3858_s5, 16384 }
 0x2c0   : > { %p2246_p6 = scmp.ne.s32.totalorder %s3797_s9, %s2245_s14  ;;  %p2250_p10 = scmp.lt.s32.totalorder %s3797_s9, %s3858_s5 }
 0x2c1   : > { %p2251_p11 = scmp.lt.s32.totalorder %s2249_s17, %s2245_s14 }
 0x2c2   : > { %p2247_p7 = pnand %p2246_p6, %p2385_p4 }
 0x2c3   : > { %p2252_p12 = por %p2251_p11, %p2250_p10 }
 0x2c4   : > { %p2248_p9 = pneg %p2247_p7 }
 0x2c6   : > { %p2253_p13 = pnand %p2252_p12, %p2248_p9 }
 0x2c8   : > { %2256 = shalt.err (!%p2253_p13)
}
 0x2c9   : > { %s2313_s27 = smov 256   ;;  %s2314_s7 = smov 16  }
 0x2ca   : > { %2149 = dma.vmem_to_hbm [thread:$0]  (%p2385_p4), %s3799_s29, 8192, %s3797_s9, %s3808_s21, %s2313_s27, %s2313_s27, %s2314_s7  }
 0x2cb PF: > { %p2155_p0 = scmp.ge.s32.totalorder %s2307_s23, 2  ;;  %s2006_s8 = sand.u32 1, %s2287_s18  }
 0x2cc   : > { %s2007_s10 = scalar_lea.sflag [#allocation3], %s2006_s8 }
 0x2cd   : > { %p2152_p1 = pnand %p2155_p0, %p2392_p8 }
 0x2cf   : > { %p2153_p2 = pneg %p2152_p1 }
 0x2d1   : > { %2282 = dma.done.wait (%p2153_p2), %s2007_s10, 8192  }
 0x2d2   : > { %2284 = vsyncadd (%p2153_p2), %s2007_s10, 4294959104  ;;  %s18_s23 = sadd.s32 1, %s2307_s23   ;;  %s3978_s18 = smov %s2291_s19 }
 0x2d3   : > { %p15_p3 = scmp.ge.s32.totalorder %s18_s23, 4   ;;  %s3979_s19 = smov %s2295_s20 }
 0x2d4   : > { %s3980_s20 = smov %s2398_s6  ;;  %s3981_s21 = smov %s2303_s22 }
 0x2d5   : > { %s3982_s22 = smov %s3984_s26  ;;  %17 = sbr.rel (!%p15_p3) target bundleno = 4 (0x4), region = 75 }
 0x2da   :  { %2012 = vsyncpa [#allocation3], 1 }
 0x2db   :  { %2014 = vsyncpa [#allocation3 + $0x1], 1 }

</bundles_post_ra>
